<compile_context>
chip_gen: v6e
topology: v6e:2x2x1
jax: 0.10.0
libtpu: 0.0.40
codegen_flags: <defaults>
</compile_context>

<pallas_src>
import jax
import jax.numpy as jnp
from jax.experimental import pallas as pl
from jax.experimental.pallas import tpu as pltpu


CENTER = (0.5001, 0.5001)


# ----------------------------------------------------------------------------
# Pallas kernel: fused per-point MLP for one row tile.
# ----------------------------------------------------------------------------
def _iphi_mlp_kernel(pin_ref, w_ref, b_ref, w4_ref, out_ref):
    f32, bf16 = jnp.float32, jnp.bfloat16

    pin = pin_ref[...]                 # (T, 128) f32: [x0,x1,angle,radius,sin,cos,0]
    x = pin[:, 0:2]                    # residual coordinates (kept in f32)
    a = pin.astype(bf16)

    # Layer 0 (fused fc0 + fc_no_code): one full-width MXU matmul, no activation.
    h = jnp.dot(a, w_ref[0], preferred_element_type=f32) + b_ref[0:1, :]
    # fc1..fc3 with tanh — bf16 MXU operands, f32 accumulation.
    h = jnp.tanh(jnp.dot(h.astype(bf16), w_ref[1], preferred_element_type=f32)
                 + b_ref[1:2, :])
    h = jnp.tanh(jnp.dot(h.astype(bf16), w_ref[2], preferred_element_type=f32)
                 + b_ref[2:3, :])
    h = jnp.tanh(jnp.dot(h.astype(bf16), w_ref[3], preferred_element_type=f32)
                 + b_ref[3:4, :])
    # fc4 head (128 -> 2) stays f32.
    xd = jnp.dot(h, w4_ref[...], preferred_element_type=f32) + b_ref[4:5, 0:2]

    out_ref[...] = x + x * xd          # out = x + x * xd


# ----------------------------------------------------------------------------
# Wrapper: feature prep (glue), weight folding/packing, row-tiled pallas_call.
# ----------------------------------------------------------------------------
def _choose_tile(n_rows, *, tile_max=1024, min_steps=8):
    """Row tile: 256-aligned (8-sublane friendly, amortizes per-step overhead),
    capped so the parallel grid keeps >= min_steps iterations when the point
    cloud is large enough (keeps both v7x TensorCores busy)."""
    t = max(256, -(-n_rows // min_steps))
    t = ((t + 255) // 256) * 256
    return min(tile_max, t)


def iphi_forward(x, params, *, tile=None):
    b, n, _ = x.shape
    width = params["width"]
    hdim = 4 * width                                   # hidden width (128)
    kin = ((4 + 2 * width + 127) // 128) * 128         # packed input width (128)
    assert kin == hdim, "packed-input fold assumes 4*width == 128 (width=32)"

    # ---------------- pointwise feature prep (cheap plain-JAX glue) ----------
    dx = x[..., 0] - CENTER[0]
    dy = x[..., 1] - CENTER[1]
    angle = jnp.arctan2(dy, dx)
    radius = jnp.sqrt(dx * dx + dy * dy)
    feat = jnp.stack([x[..., 0], x[..., 1], angle, radius], axis=-1)      # (b,n,4)
    freqs = jnp.pi * (2.0 ** jnp.arange(width // 4, dtype=jnp.float32))
    arg = feat[..., None] * freqs                                         # (b,n,4,W/4)
    x_sin = jnp.sin(arg).reshape(b, n, width)
    x_cos = jnp.cos(arg).reshape(b, n, width)
    packed = jnp.concatenate([feat, x_sin, x_cos], axis=-1)               # (b,n,4+2W)

    # --------------- flatten + pad rows / lanes (single lane-dense stream) ---
    N = b * n
    if tile is None:
        tile = _choose_tile(N)
    grid = pl.cdiv(N, tile)
    Np = grid * tile
    packed = packed.reshape(N, 4 + 2 * width).astype(jnp.float32)
    packed = jnp.pad(packed, ((0, Np - N), (0, kin - (4 + 2 * width))))

    # --------------------- weight prep: fold fc0, pack -----------------------
    hp = jax.lax.Precision.HIGHEST
    w0, b0 = params["w0"], params["b0"]
    wnc, bnc = params["wnc"], params["bnc"]
    wnca = wnc[:width]                                  # (W, 4W): acts on fc0 out
    w_first = jnp.zeros((kin, hdim), jnp.float32)
    w_first = w_first.at[0:4].set(jnp.dot(w0, wnca, precision=hp))
    w_first = w_first.at[4:4 + 2 * width].set(wnc[width:])
    b_first = bnc + jnp.dot(b0, wnca, precision=hp)     # (1, 4W)

    w_stack = jnp.stack([w_first, params["w1"], params["w2"], params["w3"]]
                        ).astype(jnp.bfloat16)          # (4, 128, 128) bf16
    b_stack = jnp.zeros((8, hdim), jnp.float32)
    b_stack = b_stack.at[0].set(b_first[0])
    b_stack = b_stack.at[1].set(params["b1"][0])
    b_stack = b_stack.at[2].set(params["b2"][0])
    b_stack = b_stack.at[3].set(params["b3"][0])
    b_stack = b_stack.at[4, 0:2].set(params["b4"][0])
    w4 = params["w4"].astype(jnp.float32)               # (128, 2) f32

    # Constant index_map -> weights/biases stay resident in VMEM across tiles.
    resident = lambda a: pl.BlockSpec(a.shape, lambda i, nd=a.ndim: (0,) * nd)

    out = pl.pallas_call(
        _iphi_mlp_kernel,
        out_shape=jax.ShapeDtypeStruct((Np, 2), jnp.float32),
        grid=(grid,),
        in_specs=[pl.BlockSpec((tile, kin), lambda i: (i, 0)),
                  resident(w_stack), resident(b_stack), resident(w4)],
        out_specs=pl.BlockSpec((tile, 2), lambda i: (i, 0)),
        compiler_params=pltpu.CompilerParams(
            dimension_semantics=("parallel",)),
    )(packed, w_stack, b_stack, w4)

    return out[:N].reshape(b, n, 2)


# ----------------------------------------------------------------------------
# Pure-JAX reference (mirrors the PyTorch forward, code=None branch, f32).
# ----------------------------------------------------------------------------
def _reference_forward(x, params):
    width = params["width"]
    dx = x[..., 0] - CENTER[0]
    dy = x[..., 1] - CENTER[1]
    angle = jnp.arctan2(dy, dx)
    radius = jnp.sqrt(dx * dx + dy * dy)
    xd = jnp.stack([x[..., 0], x[..., 1], angle, radius], axis=-1)
    b, n, d = xd.shape
    freqs = (jnp.pi * (2.0 ** jnp.arange(width // 4, dtype=jnp.float32))
             ).reshape(1, 1, 1, width // 4)
    x_sin = jnp.sin(freqs * xd[..., None]).reshape(b, n, d * width // 4)
    x_cos = jnp.cos(freqs * xd[..., None]).reshape(b, n, d * width // 4)

    hp = jax.lax.Precision.HIGHEST
    fc = lambda a, w, bias: jnp.dot(a, w, precision=hp) + bias

    xd0 = fc(xd, params["w0"], params["b0"])
    xdc = jnp.concatenate([xd0, x_sin, x_cos], axis=-1)
    h = fc(xdc, params["wnc"], params["bnc"])
    h = jnp.tanh(fc(h, params["w1"], params["b1"]))
    h = jnp.tanh(fc(h, params["w2"], params["b2"]))
    h = jnp.tanh(fc(h, params["w3"], params["b3"]))
    xdf = fc(h, params["w4"], params["b4"])
    return x + x * xdf


def _make_params(key, width=32):
    """Random Linear params stored as (in, out) so y = x @ W + b."""
    def linear(k, fin, fout):
        k1, k2 = jax.random.split(k)
        bound = fin ** -0.5
        w = jax.random.uniform(k1, (fin, fout), jnp.float32, -bound, bound)
        b = jax.random.uniform(k2, (1, fout), jnp.float32, -bound, bound)
        return w, b

    keys = jax.random.split(key, 6)
    w0, b0 = linear(keys[0], 4, width)
    wnc, bnc = linear(keys[1], 3 * width, 4 * width)
    w1, b1 = linear(keys[2], 4 * width, 4 * width)
    w2, b2 = linear(keys[3], 4 * width, 4 * width)
    w3, b3 = linear(keys[4], 4 * width, 4 * width)
    w4, b4 = linear(keys[5], 4 * width, 2)
    return dict(width=width, w0=w0, b0=b0, wnc=wnc, bnc=bnc,
                w1=w1, b1=b1, w2=w2, b2=b2, w3=w3, b3=b3, w4=w4, b4=b4)


if __name__ == "__main__":
    width = 32          # module default; hidden layers are 4*width = 128 wide
    b, n = 2, 200       # small deterministic point cloud

    key = jax.random.PRNGKey(0)
    kx, kp = jax.random.split(key)
    x = jax.random.uniform(kx, (b, n, 2), dtype=jnp.float32)   # coords in [0,1)^2
    params = _make_params(kp, width)

    out = jax.block_until_ready(iphi_forward(x, params))
    ref = jax.block_until_ready(_reference_forward(x, params))

    assert out.shape == (b, n, 2), out.shape
    # Kernel uses bf16 MXU operands (f32 accumulation); reference is f32 at
    # Precision.HIGHEST -> validate at a bf16-appropriate (still tight) tolerance.
    assert jnp.allclose(out, ref, atol=3e-3, rtol=3e-3), (
        "mismatch vs reference, max|err|=%e" % float(jnp.max(jnp.abs(out - ref))))

    print("KERNEL_OK")
</pallas_src>

<mosaic_0001>
module attributes {stable_mosaic.version = 11 : i64} {
  func.func @_iphi_mlp_kernel(%arg0: i32, %arg1: memref<256x128xf32, #tpu.memory_space<vmem>>, %arg2: memref<4x128x128xbf16, #tpu.memory_space<vmem>>, %arg3: memref<8x128xf32, #tpu.memory_space<vmem>>, %arg4: memref<128x2xf32, #tpu.memory_space<vmem>>, %arg5: memref<256x2xf32, #tpu.memory_space<vmem>>) attributes {dimension_semantics = [#tpu.dimension_semantics<parallel>], iteration_bounds = array<i64: 2>, scalar_prefetch = 0 : i64, scratch_operands = 0 : i64, tpu.core_type = #tpu.core_type<tc>, window_params = [{transform_indices = @transform_0, window_bounds = array<i64: 256, 128>}, {pipeline_mode = #tpu.pipeline_mode<synchronous>, transform_indices = @transform_1, window_bounds = array<i64: 4, 128, 128>}, {pipeline_mode = #tpu.pipeline_mode<synchronous>, transform_indices = @transform_2, window_bounds = array<i64: 8, 128>}, {pipeline_mode = #tpu.pipeline_mode<synchronous>, transform_indices = @transform_3, window_bounds = array<i64: 128, 2>}, {transform_indices = @transform_4, window_bounds = array<i64: 256, 2>}]} {
    %c0 = arith.constant 0 : index
    %c0_0 = arith.constant 0 : index
    %0 = vector.load %arg1[%c0, %c0_0] : memref<256x128xf32, #tpu.memory_space<vmem>>, vector<256x128xf32>
    %1 = vector.extract_strided_slice %0 {offsets = [0, 0], sizes = [256, 2], strides = [1, 1]} : vector<256x128xf32> to vector<256x2xf32>
    %2 = arith.truncf %0 : vector<256x128xf32> to vector<256x128xbf16>
    %c0_1 = arith.constant 0 : index
    %c0_2 = arith.constant 0 : index
    %c0_3 = arith.constant 0 : index
    %3 = vector.load %arg2[%c0_1, %c0_2, %c0_3] : memref<4x128x128xbf16, #tpu.memory_space<vmem>>, vector<1x128x128xbf16>
    %4 = vector.shape_cast %3 : vector<1x128x128xbf16> to vector<128x128xbf16>
    %cst = arith.constant dense<0.000000e+00> : vector<256x128xf32>
    %5 = tpu.matmul %2, %4, %cst {dimension_numbers = #tpu.dot_dimension_numbers<[1], [0], [0], [1], [0, 0, 1, 1], [], []>} : vector<256x128xbf16>, vector<128x128xbf16>, vector<256x128xf32> -> vector<256x128xf32>
    %c0_4 = arith.constant 0 : index
    %c0_5 = arith.constant 0 : index
    %6 = vector.load %arg3[%c0_4, %c0_5] : memref<8x128xf32, #tpu.memory_space<vmem>>, vector<1x128xf32>
    %7 = vector.broadcast %6 : vector<1x128xf32> to vector<256x128xf32>
    %8 = arith.addf %5, %7 : vector<256x128xf32>
    %9 = arith.truncf %8 : vector<256x128xf32> to vector<256x128xbf16>
    %c1 = arith.constant 1 : index
    %c0_6 = arith.constant 0 : index
    %c0_7 = arith.constant 0 : index
    %10 = vector.load %arg2[%c1, %c0_6, %c0_7] : memref<4x128x128xbf16, #tpu.memory_space<vmem>>, vector<1x128x128xbf16>
    %11 = vector.shape_cast %10 : vector<1x128x128xbf16> to vector<128x128xbf16>
    %cst_8 = arith.constant dense<0.000000e+00> : vector<256x128xf32>
    %12 = tpu.matmul %9, %11, %cst_8 {dimension_numbers = #tpu.dot_dimension_numbers<[1], [0], [0], [1], [0, 0, 1, 1], [], []>} : vector<256x128xbf16>, vector<128x128xbf16>, vector<256x128xf32> -> vector<256x128xf32>
    %c1_9 = arith.constant 1 : index
    %c0_10 = arith.constant 0 : index
    %13 = vector.load %arg3[%c1_9, %c0_10] : memref<8x128xf32, #tpu.memory_space<vmem>>, vector<1x128xf32>
    %14 = vector.broadcast %13 : vector<1x128xf32> to vector<256x128xf32>
    %15 = arith.addf %12, %14 : vector<256x128xf32>
    %16 = math.tanh %15 : vector<256x128xf32>
    %17 = arith.truncf %16 : vector<256x128xf32> to vector<256x128xbf16>
    %c2 = arith.constant 2 : index
    %c0_11 = arith.constant 0 : index
    %c0_12 = arith.constant 0 : index
    %18 = vector.load %arg2[%c2, %c0_11, %c0_12] : memref<4x128x128xbf16, #tpu.memory_space<vmem>>, vector<1x128x128xbf16>
    %19 = vector.shape_cast %18 : vector<1x128x128xbf16> to vector<128x128xbf16>
    %cst_13 = arith.constant dense<0.000000e+00> : vector<256x128xf32>
    %20 = tpu.matmul %17, %19, %cst_13 {dimension_numbers = #tpu.dot_dimension_numbers<[1], [0], [0], [1], [0, 0, 1, 1], [], []>} : vector<256x128xbf16>, vector<128x128xbf16>, vector<256x128xf32> -> vector<256x128xf32>
    %c2_14 = arith.constant 2 : index
    %c0_15 = arith.constant 0 : index
    %21 = vector.load %arg3[%c2_14, %c0_15] : memref<8x128xf32, #tpu.memory_space<vmem>>, vector<1x128xf32>
    %22 = vector.broadcast %21 : vector<1x128xf32> to vector<256x128xf32>
    %23 = arith.addf %20, %22 : vector<256x128xf32>
    %24 = math.tanh %23 : vector<256x128xf32>
    %25 = arith.truncf %24 : vector<256x128xf32> to vector<256x128xbf16>
    %c3 = arith.constant 3 : index
    %c0_16 = arith.constant 0 : index
    %c0_17 = arith.constant 0 : index
    %26 = vector.load %arg2[%c3, %c0_16, %c0_17] : memref<4x128x128xbf16, #tpu.memory_space<vmem>>, vector<1x128x128xbf16>
    %27 = vector.shape_cast %26 : vector<1x128x128xbf16> to vector<128x128xbf16>
    %cst_18 = arith.constant dense<0.000000e+00> : vector<256x128xf32>
    %28 = tpu.matmul %25, %27, %cst_18 {dimension_numbers = #tpu.dot_dimension_numbers<[1], [0], [0], [1], [0, 0, 1, 1], [], []>} : vector<256x128xbf16>, vector<128x128xbf16>, vector<256x128xf32> -> vector<256x128xf32>
    %c3_19 = arith.constant 3 : index
    %c0_20 = arith.constant 0 : index
    %29 = vector.load %arg3[%c3_19, %c0_20] : memref<8x128xf32, #tpu.memory_space<vmem>>, vector<1x128xf32>
    %30 = vector.broadcast %29 : vector<1x128xf32> to vector<256x128xf32>
    %31 = arith.addf %28, %30 : vector<256x128xf32>
    %32 = math.tanh %31 : vector<256x128xf32>
    %c0_21 = arith.constant 0 : index
    %c0_22 = arith.constant 0 : index
    %33 = vector.load %arg4[%c0_21, %c0_22] : memref<128x2xf32, #tpu.memory_space<vmem>>, vector<128x2xf32>
    %cst_23 = arith.constant dense<0.000000e+00> : vector<256x2xf32>
    %34 = tpu.matmul %32, %33, %cst_23 {dimension_numbers = #tpu.dot_dimension_numbers<[1], [0], [0], [1], [0, 0, 1, 1], [], []>} : vector<256x128xf32>, vector<128x2xf32>, vector<256x2xf32> -> vector<256x2xf32>
    %c4 = arith.constant 4 : index
    %c0_24 = arith.constant 0 : index
    %35 = vector.load %arg3[%c4, %c0_24] : memref<8x128xf32, #tpu.memory_space<vmem>>, vector<1x2xf32>
    %36 = vector.broadcast %35 : vector<1x2xf32> to vector<256x2xf32>
    %37 = arith.addf %34, %36 : vector<256x2xf32>
    %38 = arith.mulf %1, %37 : vector<256x2xf32>
    %39 = arith.addf %1, %38 : vector<256x2xf32>
    %c0_25 = arith.constant 0 : index
    %c0_26 = arith.constant 0 : index
    %40 = vector.load %arg5[%c0_25, %c0_26] : memref<256x2xf32, #tpu.memory_space<vmem>>, vector<256x2xf32>
    tpu.vector_store %arg5[%c0_25, %c0_26], %39 {strides = array<i32>} : memref<256x2xf32, #tpu.memory_space<vmem>>, vector<256x2xf32>,
    return
  }
  func.func @transform_0(%arg0: i32) -> (i32, i32) {
    %c0_i32 = arith.constant 0 : i32
    %c0_i32_0 = arith.constant 0 : i32
    return %arg0, %c0_i32 : i32, i32
  }
  func.func @transform_1(%arg0: i32) -> (i32, i32, i32) {
    %c0_i32 = arith.constant 0 : i32
    %c0_i32_0 = arith.constant 0 : i32
    %c0_i32_1 = arith.constant 0 : i32
    %c0_i32_2 = arith.constant 0 : i32
    return %c0_i32, %c0_i32_0, %c0_i32_1 : i32, i32, i32
  }
  func.func @transform_2(%arg0: i32) -> (i32, i32) {
    %c0_i32 = arith.constant 0 : i32
    %c0_i32_0 = arith.constant 0 : i32
    %c0_i32_1 = arith.constant 0 : i32
    return %c0_i32, %c0_i32_0 : i32, i32
  }
  func.func @transform_3(%arg0: i32) -> (i32, i32) {
    %c0_i32 = arith.constant 0 : i32
    %c0_i32_0 = arith.constant 0 : i32
    %c0_i32_1 = arith.constant 0 : i32
    return %c0_i32, %c0_i32_0 : i32, i32
  }
  func.func @transform_4(%arg0: i32) -> (i32, i32) {
    %c0_i32 = arith.constant 0 : i32
    %c0_i32_0 = arith.constant 0 : i32
    return %arg0, %c0_i32 : i32, i32
  }
}

</mosaic_0001>

<bundles_post_ra>
// kernel: tpu_custom_call.1
= control target key start
LH: loop header
LB: loop body
LE: loop exit
PB: predicated region body
PF: predicated region fallthrough
CT: control target
= control target key end

     0   :  { %9 = vsyncpa [#allocation3], 0  ;;  %s3188_s0 = inlined_call_operand.hbm [shape: f32[512,128], index: 0, kind: input, shape index: {}]   ;;  %s3189_s1 = inlined_call_operand.hbm [shape: bf16[4,128,128], index: 1, kind: input, shape index: {}]   ;;  %s3190_s2 = inlined_call_operand.vmem [shape: f32[8,128], index: 2, kind: input, shape index: {}]   ;;  %s3191_s3 = inlined_call_operand.vmem [shape: f32[128,2], index: 3, kind: input, shape index: {}]   ;;  %s3192_s4 = inlined_call_operand.vmem [shape: f32[512,2], index: 4, kind: output, shape index: {}]  }
   0x1   :  { %11 = vsyncpa [#allocation3 + $0x1], 0 }
   0x2   :  { %12 = vsyncpa [#allocation5], 0  ;;  %s2691_s15 = smov 0   ;;  %s2693_s16 = smov 0  }
   0x3   :  { %s2695_s17 = smov 0   ;;  %s2697_s18 = smov 0  }
   0x4 LB: > { %s1771_s19 = sadd.s32 4294967295, %s2658_s18   ;;  %p38_p0 = scmp.ne.s32.totalorder %s2650_s16, %s2646_s15  ;;  %s2658_s18 = sphi %s2697_s18, %s3208_s18   ;;  %s2654_s17 = sphi %s2695_s17, %s3207_s17   ;;  %s2650_s16 = sphi %s2693_s16, %s3206_s16   ;;  %s2646_s15 = sphi %s2691_s15, %s3205_s15  }
   0x5   : > { %p2713_p1 = scmp.eq.s32.totalorder %s1771_s19, 0  ;;  %p1773_p2 = scmp.ge.s32.totalorder %s2658_s18, 1 }
   0x6   : > { %p138_p3 = scmp.lt.s32.totalorder %s2658_s18, 3  ;;  %s2660_s23 = smov [#allocation4]  }
   0x7   : > { %s3197_s20 = scalar_select %p2713_p1, 1, 0 }
   0x8   : > { %p2721_p4 = por %p2713_p1, %p38_p0  ;;  %p2725_p5 = pnand %p1773_p2, %p138_p3 }
   0x9   : > { %s150_s24 = sshll.u32 %s2660_s23, 4  ;;  %s2738_s26 = sadd.s32 1, %s2658_s18   ;;  %s151_s24 = int_to_ptr.vmem [resolvable:$true] %s150_s24 }
   0xa   : > { %s3198_s21 = scalar_select %p2721_p4, 1, 0 }
   0xb   : > { %s3199_s22 = scalar_select %p2725_p5, 1, 0 }
   0xc   : > { %p2262_p6 = pneg %p2725_p5  ;;  %s25_s27 = sadd.s32 1, %s2654_s17 }
   0xd   : > { %s22_s28 = ssub.s32 %s2658_s18, %s2738_s26  ;;  %s2577_s29 = scalar_lea.vmem %s151_s24, 4096 }
   0xe   : > { %p2733_p7 = pnand %p2262_p6, %p2713_p1  ;;  %p2578_p9 = scmp.ne.s32.totalorder %s151_s24, %s2577_s29 }
   0xf   : > { %p2585_p12 = scmp.lt.s32.totalorder %s151_s24, %s151_s24  ;;  %p2586_p13 = scmp.lt.s32.totalorder %s2577_s29, %s2577_s29 }
  0x10   : > { %p2568_p8 = pneg %p2733_p7 }
  0x11   : > { %p2587_p0 = por %p2586_p13, %p2585_p12 }
  0x12   : > { %p2580_p10 = pnand %p2578_p9, %p2568_p8 }
  0x14   : > { %p2581_p11 = pneg %p2580_p10 }
  0x16   : > { %p2588_p2 = pnand %p2587_p0, %p2581_p11 }
  0x18   : > { %2591 = shalt.err (!%p2588_p2)
}
  0x19   : > { %s2661_s30 = smov 64   ;;  %s2662_s5 = smov 4  }
  0x1a   : > { %2265 = dma.hbm_to_vmem [thread:$0]  (!%p2733_p7), %s3189_s1, 4096, %s151_s24, [#allocation5], %s2661_s30, %s2661_s30, %s2662_s5  }
  0x1b   : > { %p23_p3 = scmp.eq.s32.totalorder %s22_s28, 0  ;;  %p32_p6 = scmp.ne.s32.totalorder %s2654_s17, %s2650_s16 }
  0x1c   : > { %p33_p8 = scmp.eq.s32.totalorder %s2658_s18, 0  ;;  %p2271_p9 = scmp.lt.s32.totalorder %s2658_s18, 2 }
  0x1d   : > { %s2755_s8 = scalar_select %p23_p3, %s2654_s17, %s25_s27  }
  0x1e   : > { %p34_p10 = por %p33_p8, %p32_p6  ;;  %s170_s9 = sand.u32 1, %s2654_s17  }
  0x1f   : > { %s1776_s10 = sshll.u32 %s170_s9, 8  ;;  %s1823_s11 = sshll.u32 %s2658_s18, 12 }
  0x20   : > { %s2762_s14 = scalar_lea.hbm %s3188_s0, %s1823_s11  ;;  %s174_s15 = scalar_lea.vmem [#allocation2], %s1776_s10 }
  0x21   : > { %s181_s23 = sshll.u32 %s174_s15, 4  ;;  %p2766_p7 = pnand %p2271_p9, %p34_p10  ;;  %s2764_s23 = int_to_ptr.vmem [resolvable:$true] %s181_s23 }
  0x22   : > { %s2770_s25 = scalar_lea.sflag [#allocation3], %s170_s9  ;;  %s2592_s27 = scalar_lea.hbm %s2762_s14, 4096 }
  0x23   : > { %p2593_p11 = scmp.ne.s32.totalorder %s2762_s14, %s2592_s27  ;;  %p2594_p12 = pneg %p2766_p7 }
  0x24   : > { %s2597_s30 = scalar_lea.hbm %s3188_s0, 8192  ;;  %p2598_p2 = scmp.lt.s32.totalorder %s2762_s14, %s3188_s0 }
  0x25   : > { %p2595_p13 = pnand %p2594_p12, %p2593_p11  ;;  %p2599_p3 = scmp.lt.s32.totalorder %s2597_s30, %s2592_s27 }
  0x27   : > { %p2596_p0 = pneg %p2595_p13  ;;  %p2600_p6 = por %p2599_p3, %p2598_p2 }
  0x29   : > { %p2601_p8 = pnand %p2600_p6, %p2596_p0 }
  0x2b   : > { %2604 = shalt.err (!%p2601_p8)
}
  0x2c   : > { %s2605_s7 = scalar_lea.vmem %s2764_s23, 4096  ;;  %s2663_s9 = smov [#allocation2]  }
  0x2d   : > { %p2606_p9 = scmp.ne.s32.totalorder %s2764_s23, %s2605_s7  ;;  %s2610_s10 = sshll.u32 %s2663_s9, 4  ;;  %s2611_s10 = int_to_ptr.vmem [resolvable:$false] %s2610_s10 }
  0x2e   : > { %s2612_s11 = scalar_lea.vmem %s2611_s10, 8192  ;;  %p2613_p13 = scmp.lt.s32.totalorder %s2764_s23, %s2611_s10 }
  0x2f   : > { %p2608_p10 = pnand %p2606_p9, %p2594_p12  ;;  %p2614_p1 = scmp.lt.s32.totalorder %s2612_s11, %s2605_s7 }
  0x31   : > { %p2609_p11 = pneg %p2608_p10  ;;  %p2615_p4 = por %p2614_p1, %p2613_p13 }
  0x33   : > { %p2616_p5 = pnand %p2615_p4, %p2609_p11 }
  0x35   : > { %2619 = shalt.err (!%p2616_p5)
}
  0x36   : > { %s2664_s12 = smov 128   ;;  %s2665_s13 = smov 8  }
  0x37   : > { %2269 = dma.hbm_to_vmem [thread:$0]  (!%p2766_p7), %s2762_s14, 4096, %s2764_s23, %s2770_s25, %s2664_s12, %s2664_s12, %s2665_s13  }
  0x38   : > { %p3202_p12 = scmp.ne.s32.totalorder %s3199_s22, 0 }
  0x39   : > { %s195_s15 = sand.u32 (!%p3202_p12), 1, %s2650_s16   ;;  %p3203_p1 = scmp.ne.s32.totalorder (!%p3202_p12), %s3198_s21, 0 }
  0x3a   : > { %193 = sbr.rel (%p3202_p12) target bundleno = 1217 (0x4c1), region = 36  ;;  %s1780_s27 = sshll.u32 (!%p3202_p12), %s195_s15, 8 }
  0x3b   : > { %s196_s28 = scalar_lea.sflag (!%p3202_p12), [#allocation3], %s195_s15  ;;  %s2794_s29 = scalar_lea.vmem (!%p3202_p12), [#allocation2], %s1780_s27 }
  0x3f   : > { %2637 = dma.done.wait (%p3203_p1), %s196_s28, 4096  }
  0x40   : > { %2639 = vsyncadd (%p3203_p1), %s196_s28, 4294963200  ;;  %p3204_p4 = scmp.ne.s32.totalorder %s3197_s20, 0 }
  0x42   : > { %2641 = dma.done.wait (%p3204_p4), [#allocation5], 4096  }
  0x43   : > { %2643 = vsyncadd (%p3204_p4), [#allocation5], 4294963200  ;;  %v2310_v0 = vld [vmem:[#allocation4 + $0x38] sm:$0xff]   ;;  %v2311_v1 = vld [vmem:[#allocation4 + $0x30] sm:$0xff]   ;;  %s1782_s22 = sshll.u32 %s1771_s19, 5  ;;  %vm1661_vm0 = vcmask 15360  }
  0x44   : > { %1968 = vmatprep.subr.bf16.mxu0 %v2310_v0  ;;  %2240 = vmatprep.subr.bf16.mxu1 %v2310_v0  ;;  %v2312_v2 = vld [vmem:[#allocation4 + $0x28] sm:$0xff]   ;;  %v2313_v3 = vld [vmem:[#allocation4 + $0x20] sm:$0xff]   ;;  %v2314_v7 = vld [vmem:[#allocation4 + $0x18] sm:$0xff]   ;;  %p230_p5 = scmp.lt.s32.totalorder %s1782_s22, 63 }
  0x45   : > { %1969 = vmatpush3.bf16.msra.mxu0 %v2310_v0  ;;  %2248 = vmatpush3.bf16.msra.mxu1 %v2310_v0  ;;  %v236_v4 = vld [vmem:[%s2794_s29] sm:$0xff]  ;;  %v237_v5 = vld [vmem:[%s2794_s29 + $0x8] sm:$0xff]  ;;  %v2315_v11 = vld [vmem:[#allocation4 + $0x10] sm:$0xff]  }
  0x46   : > { %1970 = vmatprep.subr.bf16.mxu0 %v2311_v1  ;;  %2241 = vmatprep.subr.bf16.mxu1 %v2311_v1  ;;  %v268_v6 = vpack.c.bf16 %v237_v5, %v236_v4  ;;  %v252_v8 = vld [vmem:[%s2794_s29 + $0x80] sm:$0xff]  ;;  %v253_v9 = vld [vmem:[%s2794_s29 + $0x88] sm:$0xff]  ;;  %v238_v14 = vld [vmem:[%s2794_s29 + $0x10] sm:$0xff]  ;;  %s3210_s22 = smov (!%p230_p5, %s1782_s22), 63 }
  0x47   : > { %v276_v10 = vpack.c.bf16 %v253_v9, %v252_v8  ;;  %v2316_v12 = vld [vmem:[#allocation4 + $0x8] sm:$0xff]   ;;  %v2317_v13 = vld [vmem:[#allocation4] sm:$0xff]   ;;  %v239_v15 = vld [vmem:[%s2794_s29 + $0x18] sm:$0xff]  ;;  %s1783_s24 = sshll.u32 %s3210_s22, 3 }
  0x48   : > { %1984 = vmatprep.mubr.bf16.mxu0 %v268_v6  ;;  %v240_v16 = vld [vmem:[%s2794_s29 + $0x20] sm:$0xff]  ;;  %v241_v17 = vld [vmem:[%s2794_s29 + $0x28] sm:$0xff]  ;;  %v254_v18 = vld [vmem:[%s2794_s29 + $0x90] sm:$0xff]  ;;  %v269_v23 = vpack.c.bf16 %v239_v15, %v238_v14  ;;  %s3048_s19 = scalar_lea.vmem %s3192_s4, %s1783_s24 }
  0x49   : > { %1971 = vmatpush3.bf16.msra.mxu0 %v2311_v1  ;;  %2249 = vmatpush3.bf16.msra.mxu1 %v2311_v1  ;;  %v255_v19 = vld [vmem:[%s2794_s29 + $0x98] sm:$0xff]  ;;  %v256_v20 = vld [vmem:[%s2794_s29 + $0xa0] sm:$0xff]  ;;  %v257_v21 = vld [vmem:[%s2794_s29 + $0xa8] sm:$0xff]  ;;  %v270_v24 = vpack.c.bf16 %v241_v17, %v240_v16 }
  0x4a   : > { %1972 = vmatprep.subr.bf16.mxu0 %v2312_v2  ;;  %2242 = vmatprep.subr.bf16.mxu1 %v2312_v2  ;;  %v2318_v22 = vld [vmem:[#allocation4 + $0x78] sm:$0xff]   ;;  %v277_v25 = vpack.c.bf16 %v255_v19, %v254_v18  ;;  %v2319_v26 = vld [vmem:[#allocation4 + $0x70] sm:$0xff]   ;;  %v278_v27 = vpack.c.bf16 %v257_v21, %v256_v20  ;;  %v244_v30 = vld [vmem:[%s2794_s29 + $0x40] sm:$0xff] }
  0x4b   : > { %2000 = vmatprep.mubr.bf16.mxu1 %v276_v10  ;;  %v242_v28 = vld [vmem:[%s2794_s29 + $0x30] sm:$0xff]  ;;  %v243_v29 = vld [vmem:[%s2794_s29 + $0x38] sm:$0xff]  ;;  %v245_v31 = vld [vmem:[%s2794_s29 + $0x48] sm:$0xff] }
  0x4c   : > { %v258_v32 = vld [vmem:[%s2794_s29 + $0xb0] sm:$0xff]  ;;  %v259_v33 = vld [vmem:[%s2794_s29 + $0xb8] sm:$0xff]  ;;  %v260_v34 = vld [vmem:[%s2794_s29 + $0xc0] sm:$0xff]  ;;  %v271_v37 = vpack.c.bf16 %v243_v29, %v242_v28  ;;  %v272_v38 = vpack.c.bf16 %v245_v31, %v244_v30 }
  0x4d   : > { %1973 = vmatpush3.bf16.msra.mxu0 %v2312_v2  ;;  %2250 = vmatpush3.bf16.msra.mxu1 %v2312_v2  ;;  %v261_v35 = vld [vmem:[%s2794_s29 + $0xc8] sm:$0xff]  ;;  %v279_v39 = vpack.c.bf16 %v259_v33, %v258_v32  ;;  %v2321_v41 = vld [vmem:[#allocation4 + $0x60] sm:$0xff]   ;;  %v246_v42 = vld [vmem:[%s2794_s29 + $0x50] sm:$0xff] }
  0x4e   : > { %1974 = vmatprep.subr.bf16.mxu0 %v2313_v3  ;;  %2243 = vmatprep.subr.bf16.mxu1 %v2313_v3  ;;  %v2320_v36 = vld [vmem:[#allocation4 + $0x68] sm:$0xff]   ;;  %v280_v40 = vpack.c.bf16 %v261_v35, %v260_v34  ;;  %v247_v43 = vld [vmem:[%s2794_s29 + $0x58] sm:$0xff]  ;;  %v248_v44 = vld [vmem:[%s2794_s29 + $0x60] sm:$0xff] }
  0x4f   : > { %v249_v45 = vld [vmem:[%s2794_s29 + $0x68] sm:$0xff]  ;;  %v262_v46 = vld [vmem:[%s2794_s29 + $0xd0] sm:$0xff]  ;;  %v263_v47 = vld [vmem:[%s2794_s29 + $0xd8] sm:$0xff]  ;;  %v273_v51 = vpack.c.bf16 %v247_v43, %v246_v42 }
  0x50   : > { %v264_v48 = vld [vmem:[%s2794_s29 + $0xe0] sm:$0xff]  ;;  %v265_v49 = vld [vmem:[%s2794_s29 + $0xe8] sm:$0xff]  ;;  %v2322_v50 = vld [vmem:[#allocation4 + $0x58] sm:$0xff]   ;;  %v274_v52 = vpack.c.bf16 %v249_v45, %v248_v44  ;;  %v281_v53 = vpack.c.bf16 %v263_v47, %v262_v46 }
  0x51   : > { %1975 = vmatpush3.bf16.msra.mxu0 %v2313_v3  ;;  %2251 = vmatpush3.bf16.msra.mxu1 %v2313_v3  ;;  %v282_v54 = vpack.c.bf16 %v265_v49, %v264_v48  ;;  %v2323_v55 = vld [vmem:[#allocation4 + $0x50] sm:$0xff]   ;;  %v251_v57 = vld [vmem:[%s2794_s29 + $0x78] sm:$0xff]  ;;  %v2324_v62 = vld [vmem:[#allocation4 + $0x48] sm:$0xff]  }
  0x52   : > { %1976 = vmatprep.subr.bf16.mxu0 %v2314_v7  ;;  %2244 = vmatprep.subr.bf16.mxu1 %v2314_v7  ;;  %v250_v56 = vld [vmem:[%s2794_s29 + $0x70] sm:$0xff]  ;;  %v267_v59 = vld [vmem:[%s2794_s29 + $0xf8] sm:$0xff]  ;;  %v2325_v63 = vld [vmem:[#allocation4 + $0x40] sm:$0xff]  }
  0x53   : > { %v266_v58 = vld [vmem:[%s2794_s29 + $0xf0] sm:$0xff]  ;;  %v275_v60 = vpack.c.bf16 %v251_v57, %v250_v56  ;;  %v2326_v0 = vld [vmem:[#allocation4 + $0xb8] sm:$0xff]  }
  0x54   : > { %v283_v61 = vpack.c.bf16 %v267_v59, %v266_v58  ;;  %v2327_v1 = vld [vmem:[#allocation4 + $0xb0] sm:$0xff]  }
  0x55   : > { %1977 = vmatpush3.bf16.msra.mxu0 %v2314_v7  ;;  %2252 = vmatpush3.bf16.msra.mxu1 %v2314_v7  ;;  %v2841_v7 = vld [vmem:[%s3190_s2] ss:$0 sm:$0xff] }
  0x56   : > { %1978 = vmatprep.subr.bf16.mxu0 %v2315_v11  ;;  %2245 = vmatprep.subr.bf16.mxu1 %v2315_v11 }
  0x59   : > { %1979 = vmatpush3.bf16.msra.mxu0 %v2315_v11  ;;  %2253 = vmatpush3.bf16.msra.mxu1 %v2315_v11 }
  0x5a   : > { %1980 = vmatprep.subr.bf16.mxu0 %v2316_v12  ;;  %2246 = vmatprep.subr.bf16.mxu1 %v2316_v12 }
  0x5d   : > { %1981 = vmatpush3.bf16.msra.mxu0 %v2316_v12  ;;  %2254 = vmatpush3.bf16.msra.mxu1 %v2316_v12 }
  0x5e   : > { %1982 = vmatprep.subr.bf16.mxu0 %v2317_v13  ;;  %2247 = vmatprep.subr.bf16.mxu1 %v2317_v13 }
  0x61   : > { %1983 = vmatpush3.bf16.msra.mxu0 %v2317_v13  ;;  %2255 = vmatpush3.bf16.msra.mxu1 %v2317_v13 }
  0x62   : > { %2016 = vmatprep.subr.bf16.mxu1 %v2318_v22  ;;  %2064 = vmatprep.subr.bf16.mxu0 %v2326_v0 }
  0x64   : > { %1985 = vmatmul.mubr.bf16.vlgmr.msra.gmra.mxu0 %v269_v23  ;;  %2001 = vmatmul.mubr.bf16.vlgmr.msra.gmra.mxu1 %v277_v25 }
  0x65   : > { %1988 = vmatprep.mubr.bf16.mxu0 %v270_v24  ;;  %2004 = vmatprep.mubr.bf16.mxu1 %v278_v27 }
  0x66   : > { %2017 = vmatpush3.bf16.msra.mxu1 %v2318_v22  ;;  %2065 = vmatpush3.bf16.msra.mxu0 %v2326_v0 }
  0x67   : > { %2018 = vmatprep.subr.bf16.mxu1 %v2319_v26  ;;  %2066 = vmatprep.subr.bf16.mxu0 %v2327_v1 }
  0x6a   : > { %2019 = vmatpush3.bf16.msra.mxu1 %v2319_v26  ;;  %2067 = vmatpush3.bf16.msra.mxu0 %v2327_v1 }
  0x6b   : > { %2020 = vmatprep.subr.bf16.mxu1 %v2320_v36 }
  0x6c   : > { %1989 = vmatmul.mubr.bf16.gmra.mxu0 %v271_v37  ;;  %2005 = vmatmul.mubr.bf16.gmra.mxu1 %v279_v39 }
  0x6d   : > { %1992 = vmatprep.mubr.bf16.mxu0 %v272_v38  ;;  %2008 = vmatprep.mubr.bf16.mxu1 %v280_v40 }
  0x6e   : > { %2021 = vmatpush3.bf16.msra.mxu1 %v2320_v36 }
  0x6f   : > { %2022 = vmatprep.subr.bf16.mxu1 %v2321_v41 }
  0x72   : > { %2023 = vmatpush3.bf16.msra.mxu1 %v2321_v41 }
  0x73   : > { %2024 = vmatprep.subr.bf16.mxu1 %v2322_v50 }
  0x74   : > { %1993 = vmatmul.mubr.bf16.gmra.mxu0 %v273_v51  ;;  %2009 = vmatmul.mubr.bf16.gmra.mxu1 %v281_v53 }
  0x75   : > { %1996 = vmatprep.mubr.bf16.mxu0 %v274_v52  ;;  %2012 = vmatprep.mubr.bf16.mxu1 %v282_v54 }
  0x76   : > { %2025 = vmatpush3.bf16.msra.mxu1 %v2322_v50 }
  0x77   : > { %2026 = vmatprep.subr.bf16.mxu1 %v2323_v55 }
  0x7a   : > { %2027 = vmatpush3.bf16.msra.mxu1 %v2323_v55 }
  0x7b   : > { %2028 = vmatprep.subr.bf16.mxu1 %v2324_v62 }
  0x7c   : > { %1997 = vmatmul.mubr.bf16.gmra.mxu0 %v275_v60  ;;  %2013 = vmatmul.mubr.bf16.gmra.mxu1 %v283_v61 }
  0x7e   : > { %2029 = vmatpush3.bf16.msra.mxu1 %v2324_v62 }
  0x7f   : > { %2030 = vmatprep.subr.bf16.mxu1 %v2325_v63 }
  0x82   : > { %2031 = vmatpush3.bf16.msra.mxu1 %v2325_v63 }
 0x124   : > { %v1986_v2 = vpop.f32.mrf.mxu0  ;;  %v2836_v3 = vpop.f32.mrf.mxu1 }
 0x125   : > { %v396_v14 = vadd.f32 %v1986_v2, %v2841_v7  ;;  %v460_v60 = vadd.f32 %v2836_v3, %v2841_v7 }
 0x126   : > { %v387_v4 = vpop.f32.mrf.mxu0  ;;  %v451_v5 = vpop.f32.mrf.mxu1 }
 0x127   : > { %v388_v11 = vadd.f32 %v2841_v7, %v387_v4  ;;  %v452_v46 = vadd.f32 %v2841_v7, %v451_v5 }
 0x128   : > { %v1987_v6 = vpop.f32.mrf.mxu0  ;;  %v2003_v8 = vpop.f32.mrf.mxu1 }
 0x129   : > { %v399_v9 = vadd.f32 %v1987_v6, %v2841_v7  ;;  %v463_v61 = vadd.f32 %v2003_v8, %v2841_v7 }
 0x12a   : > { %v390_v10 = vpop.f32.mrf.mxu0  ;;  %v454_v13 = vpop.f32.mrf.mxu1 }
 0x12b   : > { %v391_v12 = vadd.f32 %v2841_v7, %v390_v10  ;;  %v515_v18 = vpack.c.bf16 %v399_v9, %v396_v14  ;;  %v455_v47 = vadd.f32 %v2841_v7, %v454_v13  ;;  %v523_v0 = vpack.c.bf16 %v463_v61, %v460_v60 }
 0x12c   : > { %v1990_v15 = vpop.f32.mrf.mxu0  ;;  %v2006_v17 = vpop.f32.mrf.mxu1 }
 0x12d   : > { %v514_v16 = vpack.c.bf16 %v391_v12, %v388_v11  ;;  %v412_v27 = vadd.f32 %v1990_v15, %v2841_v7  ;;  %v522_v55 = vpack.c.bf16 %v455_v47, %v452_v46  ;;  %v476_v5 = vadd.f32 %v2006_v17, %v2841_v7 }
 0x12e   : > { %v403_v19 = vpop.f32.mrf.mxu0  ;;  %v467_v20 = vpop.f32.mrf.mxu1 }
 0x12f   : > { %2032 = vmatprep.mubr.bf16.mxu1 %v514_v16  ;;  %v404_v25 = vadd.f32 %v2841_v7, %v403_v19  ;;  %v468_v58 = vadd.f32 %v2841_v7, %v467_v20  ;;  %v2328_v20 = vld [vmem:[#allocation4 + $0xa8] sm:$0xff]  }
 0x130   : > { %v1991_v21 = vpop.f32.mrf.mxu0  ;;  %2033 = vmatmul.mubr.bf16.vlgmr.msra.gmra.mxu1 %v515_v18  ;;  %v2007_v24 = vpop.f32.mrf.mxu1  ;;  %2068 = vmatprep.subr.bf16.mxu0 %v2328_v20 }
 0x131   : > { %v415_v22 = vadd.f32 %v1991_v21, %v2841_v7  ;;  %v479_v6 = vadd.f32 %v2007_v24, %v2841_v7  ;;  %2069 = vmatpush3.bf16.msra.mxu0 %v2328_v20  ;;  %v2329_v21 = vld [vmem:[#allocation4 + $0xa0] sm:$0xff]   ;;  %v2332_v24 = vld [vmem:[#allocation4 + $0x88] sm:$0xff]  }
 0x132   : > { %v406_v23 = vpop.f32.mrf.mxu0  ;;  %v470_v32 = vpop.f32.mrf.mxu1  ;;  %2070 = vmatprep.subr.bf16.mxu0 %v2329_v21 }
 0x133   : > { %v407_v26 = vadd.f32 %v2841_v7, %v406_v23  ;;  %v517_v30 = vpack.c.bf16 %v415_v22, %v412_v27  ;;  %v471_v59 = vadd.f32 %v2841_v7, %v470_v32  ;;  %v525_v11 = vpack.c.bf16 %v479_v6, %v476_v5  ;;  %v2330_v22 = vld [vmem:[#allocation4 + $0x98] sm:$0xff]   ;;  %v2331_v23 = vld [vmem:[#allocation4 + $0x90] sm:$0xff]   ;;  %v2336_v27 = vld [vmem:[#allocation4 + $0xe8] sm:$0xff]  }
 0x134   : > { %v1994_v28 = vpop.f32.mrf.mxu0  ;;  %v2010_v36 = vpop.f32.mrf.mxu1 }
 0x135   : > { %v516_v29 = vpack.c.bf16 %v407_v26, %v404_v25  ;;  %v428_v39 = vadd.f32 %v1994_v28, %v2841_v7  ;;  %v524_v63 = vpack.c.bf16 %v471_v59, %v468_v58  ;;  %v492_v13 = vadd.f32 %v2010_v36, %v2841_v7  ;;  %2071 = vmatpush3.bf16.msra.mxu0 %v2329_v21  ;;  %v2333_v25 = vld [vmem:[#allocation4 + $0x80] sm:$0xff]   ;;  %v2335_v26 = vld [vmem:[#allocation4 + $0xf0] sm:$0xff]  }
 0x136   : > { %v419_v31 = vpop.f32.mrf.mxu0  ;;  %v483_v44 = vpop.f32.mrf.mxu1  ;;  %2072 = vmatprep.subr.bf16.mxu0 %v2330_v22  ;;  %v2337_v28 = vld [vmem:[#allocation4 + $0xe0] sm:$0xff]  }
 0x137   : > { %2036 = vmatprep.mubr.bf16.mxu1 %v516_v29  ;;  %v420_v37 = vadd.f32 %v2841_v7, %v419_v31  ;;  %v484_v2 = vadd.f32 %v2841_v7, %v483_v44  ;;  %v2338_v29 = vld [vmem:[#allocation4 + $0xd8] sm:$0xff]   ;;  %v2879_v31 = vld [vmem:[%s3190_s2 + $0x1] ss:$0 sm:$0xff] }
 0x138   : > { %v1995_v33 = vpop.f32.mrf.mxu0  ;;  %2037 = vmatmul.mubr.bf16.gmra.mxu1 %v517_v30  ;;  %v2011_v50 = vpop.f32.mrf.mxu1 }
 0x139   : > { %v431_v34 = vadd.f32 %v1995_v33, %v2841_v7  ;;  %v495_v14 = vadd.f32 %v2011_v50, %v2841_v7  ;;  %2073 = vmatpush3.bf16.msra.mxu0 %v2330_v22 }
 0x13a   : > { %v422_v35 = vpop.f32.mrf.mxu0  ;;  %v486_v57 = vpop.f32.mrf.mxu1  ;;  %2074 = vmatprep.subr.bf16.mxu0 %v2331_v23 }
 0x13b   : > { %v423_v38 = vadd.f32 %v2841_v7, %v422_v35  ;;  %v519_v42 = vpack.c.bf16 %v431_v34, %v428_v39  ;;  %v487_v4 = vadd.f32 %v2841_v7, %v486_v57  ;;  %v527_v16 = vpack.c.bf16 %v495_v14, %v492_v13 }
 0x13c   : > { %v1998_v40 = vpop.f32.mrf.mxu0  ;;  %v2014_v62 = vpop.f32.mrf.mxu1 }
 0x13d   : > { %v518_v41 = vpack.c.bf16 %v423_v38, %v420_v37  ;;  %v444_v53 = vadd.f32 %v1998_v40, %v2841_v7  ;;  %v526_v10 = vpack.c.bf16 %v487_v4, %v484_v2  ;;  %v508_v17 = vadd.f32 %v2014_v62, %v2841_v7  ;;  %2075 = vmatpush3.bf16.msra.mxu0 %v2331_v23 }
 0x13e   : > { %v435_v43 = vpop.f32.mrf.mxu0  ;;  %v499_v1 = vpop.f32.mrf.mxu1  ;;  %2076 = vmatprep.subr.bf16.mxu0 %v2332_v24 }
 0x13f   : > { %2040 = vmatprep.mubr.bf16.mxu1 %v518_v41  ;;  %v436_v51 = vadd.f32 %v2841_v7, %v435_v43  ;;  %v500_v8 = vadd.f32 %v2841_v7, %v499_v1 }
 0x140   : > { %v1999_v45 = vpop.f32.mrf.mxu0  ;;  %2041 = vmatmul.mubr.bf16.gmra.mxu1 %v519_v42  ;;  %v2015_v9 = vpop.f32.mrf.mxu1 }
 0x141   : > { %v447_v48 = vadd.f32 %v1999_v45, %v2841_v7  ;;  %v511_v18 = vadd.f32 %v2015_v9, %v2841_v7  ;;  %2077 = vmatpush3.bf16.msra.mxu0 %v2332_v24 }
 0x142   : > { %v438_v49 = vpop.f32.mrf.mxu0  ;;  %v502_v3 = vpop.f32.mrf.mxu1  ;;  %2078 = vmatprep.subr.bf16.mxu0 %v2333_v25 }
 0x143   : > { %v439_v52 = vadd.f32 %v2841_v7, %v438_v49  ;;  %v521_v56 = vpack.c.bf16 %v447_v48, %v444_v53  ;;  %v503_v12 = vadd.f32 %v2841_v7, %v502_v3  ;;  %v529_v19 = vpack.c.bf16 %v511_v18, %v508_v17  ;;  %v2334_v7 = vld [vmem:[#allocation4 + $0xf8] sm:$0xff]  }
 0x144   : > { %2112 = vmatprep.subr.bf16.mxu1 %v2334_v7 }
 0x145   : > { %v520_v54 = vpack.c.bf16 %v439_v52, %v436_v51  ;;  %v528_v15 = vpack.c.bf16 %v503_v12, %v500_v8  ;;  %2079 = vmatpush3.bf16.msra.mxu0 %v2333_v25  ;;  %2113 = vmatpush3.bf16.msra.mxu1 %v2334_v7 }
 0x146   : > { %2114 = vmatprep.subr.bf16.mxu1 %v2335_v26 }
 0x147   : > { %2044 = vmatprep.mubr.bf16.mxu1 %v520_v54 }
 0x148   : > { %2045 = vmatmul.mubr.bf16.gmra.mxu1 %v521_v56 }
 0x149   : > { %2048 = vmatprep.mubr.bf16.mxu1 %v522_v55  ;;  %2115 = vmatpush3.bf16.msra.mxu1 %v2335_v26 }
 0x14a   : > { %2116 = vmatprep.subr.bf16.mxu1 %v2336_v27 }
 0x14d   : > { %2117 = vmatpush3.bf16.msra.mxu1 %v2336_v27 }
 0x14e   : > { %2118 = vmatprep.subr.bf16.mxu1 %v2337_v28 }
 0x150   : > { %2049 = vmatmul.mubr.bf16.gmra.mxu1 %v523_v0 }
 0x151   : > { %2052 = vmatprep.mubr.bf16.mxu1 %v524_v63  ;;  %2119 = vmatpush3.bf16.msra.mxu1 %v2337_v28 }
 0x152   : > { %2120 = vmatprep.subr.bf16.mxu1 %v2338_v29 }
 0x155   : > { %2121 = vmatpush3.bf16.msra.mxu1 %v2338_v29 }
 0x158   : > { %2053 = vmatmul.mubr.bf16.gmra.mxu1 %v525_v11 }
 0x159   : > { %2056 = vmatprep.mubr.bf16.mxu1 %v526_v10 }
 0x160   : > { %2057 = vmatmul.mubr.bf16.gmra.mxu1 %v527_v16 }
 0x161   : > { %2060 = vmatprep.mubr.bf16.mxu1 %v528_v15 }
 0x168   : > { %2061 = vmatmul.mubr.bf16.gmra.mxu1 %v529_v19 }
 0x1f0   : > { %v2034_v30 = vpop.f32.mrf.mxu1 }
 0x1f1   : > { %v643_v36 = vadd.f32 %v2034_v30, %v2879_v31 }
 0x1f2   : > { %v634_v32 = vpop.f32.mrf.mxu1 }
 0x1f3   : > { %v635_v33 = vadd.f32 %v2879_v31, %v634_v32 }
 0x1f4   : > { %v2035_v34 = vpop.f32.mrf.mxu1 }
 0x1f5   : > { %v646_v35 = vadd.f32 %v2035_v34, %v2879_v31  ;;  %2342 = vtanh.f32 %v635_v33 }
 0x1f6   : > { %v637_v37 = vpop.f32.mrf.mxu1 }
 0x1f7   : > { %v638_v38 = vadd.f32 %v2879_v31, %v637_v37  ;;  %2344 = vtanh.f32 %v646_v35 }
 0x1f8   : > { %v2038_v39 = vpop.f32.mrf.mxu1 }
 0x1f9   : > { %2346 = vtanh.f32 %v638_v38  ;;  %v659_v44 = vadd.f32 %v2038_v39, %v2879_v31 }
 0x1fa   : > { %2348 = vtanh.f32 %v643_v36  ;;  %v650_v40 = vpop.f32.mrf.mxu1 }
 0x1fb   : > { %v651_v41 = vadd.f32 %v2879_v31, %v650_v40 }
 0x1fc   : > { %v2039_v42 = vpop.f32.mrf.mxu1 }
 0x1fd   : > { %v662_v43 = vadd.f32 %v2039_v42, %v2879_v31  ;;  %2350 = vtanh.f32 %v651_v41 }
 0x1fe   : > { %v653_v45 = vpop.f32.mrf.mxu1 }
 0x1ff   : > { %v654_v46 = vadd.f32 %v2879_v31, %v653_v45  ;;  %2352 = vtanh.f32 %v662_v43 }
 0x200   : > { %v2042_v47 = vpop.f32.mrf.mxu1 }
 0x201   : > { %2354 = vtanh.f32 %v654_v46  ;;  %v675_v55 = vadd.f32 %v2042_v47, %v2879_v31 }
 0x202   : > { %2356 = vtanh.f32 %v659_v44  ;;  %v666_v48 = vpop.f32.mrf.mxu1  ;;  %v2343_v50 = vpop.eup %2342 }
 0x203   : > { %v667_v49 = vadd.f32 %v2879_v31, %v666_v48 }
 0x204   : > { %v2043_v51 = vpop.f32.mrf.mxu1  ;;  %v2345_v52 = vpop.eup %2344 }
 0x205   : > { %v678_v53 = vadd.f32 %v2043_v51, %v2879_v31  ;;  %2358 = vtanh.f32 %v667_v49 }
 0x206   : > { %v2347_v54 = vpop.eup %2346  ;;  %v669_v56 = vpop.f32.mrf.mxu1 }
 0x207   : > { %v2349_v57 = vpop.eup %2348  ;;  %v670_v58 = vadd.f32 %v2879_v31, %v669_v56  ;;  %v793_v59 = vpack.c.bf16 %v2347_v54, %v2343_v50  ;;  %2360 = vtanh.f32 %v678_v53 }
 0x208   : > { %v2046_v60 = vpop.f32.mrf.mxu1  ;;  %v794_v61 = vpack.c.bf16 %v2345_v52, %v2349_v57 }
 0x209   : > { %2362 = vtanh.f32 %v670_v58  ;;  %2080 = vmatprep.mubr.bf16.mxu0 %v793_v59  ;;  %v691_v6 = vadd.f32 %v2046_v60, %v2879_v31 }
 0x20a   : > { %2364 = vtanh.f32 %v675_v55  ;;  %v682_v62 = vpop.f32.mrf.mxu1  ;;  %2081 = vmatmul.mubr.bf16.vlgmr.msra.gmra.mxu0 %v794_v61  ;;  %v2351_v0 = vpop.eup %2350 }
 0x20b   : > { %v683_v63 = vadd.f32 %v2879_v31, %v682_v62 }
 0x20c   : > { %v2047_v1 = vpop.f32.mrf.mxu1  ;;  %v2353_v2 = vpop.eup %2352 }
 0x20d   : > { %v694_v4 = vadd.f32 %v2047_v1, %v2879_v31  ;;  %2366 = vtanh.f32 %v683_v63 }
 0x20e   : > { %v2355_v5 = vpop.eup %2354  ;;  %v685_v9 = vpop.f32.mrf.mxu1 }
 0x20f   : > { %v2357_v10 = vpop.eup %2356  ;;  %v686_v11 = vadd.f32 %v2879_v31, %v685_v9  ;;  %v795_v3 = vpack.c.bf16 %v2355_v5, %v2351_v0  ;;  %2368 = vtanh.f32 %v694_v4 }
 0x210   : > { %v2050_v8 = vpop.f32.mrf.mxu1  ;;  %v796_v12 = vpack.c.bf16 %v2353_v2, %v2357_v10 }
 0x211   : > { %2370 = vtanh.f32 %v686_v11  ;;  %2084 = vmatprep.mubr.bf16.mxu0 %v795_v3  ;;  %v707_v20 = vadd.f32 %v2050_v8, %v2879_v31 }
 0x212   : > { %2372 = vtanh.f32 %v691_v6  ;;  %v698_v13 = vpop.f32.mrf.mxu1  ;;  %2085 = vmatmul.mubr.bf16.gmra.mxu0 %v796_v12  ;;  %v2359_v15 = vpop.eup %2358 }
 0x213   : > { %v699_v14 = vadd.f32 %v2879_v31, %v698_v13 }
 0x214   : > { %v2051_v16 = vpop.f32.mrf.mxu1  ;;  %v2361_v17 = vpop.eup %2360 }
 0x215   : > { %v710_v18 = vadd.f32 %v2051_v16, %v2879_v31  ;;  %2374 = vtanh.f32 %v699_v14  ;;  %v2339_v16 = vld [vmem:[#allocation4 + $0xd0] sm:$0xff]  }
 0x216   : > { %v2363_v19 = vpop.eup %2362  ;;  %v701_v21 = vpop.f32.mrf.mxu1  ;;  %2122 = vmatprep.subr.bf16.mxu1 %v2339_v16 }
 0x217   : > { %v2365_v22 = vpop.eup %2364  ;;  %v702_v23 = vadd.f32 %v2879_v31, %v701_v21  ;;  %v797_v24 = vpack.c.bf16 %v2363_v19, %v2359_v15  ;;  %2376 = vtanh.f32 %v710_v18  ;;  %2123 = vmatpush3.bf16.msra.mxu1 %v2339_v16  ;;  %v2341_v18 = vld [vmem:[#allocation4 + $0xc0] sm:$0xff]   ;;  %v1366_v19 = vld [vmem:[%s3191_s3 + $0x78] sm:$0xff]  ;;  %v1364_v21 = vld [vmem:[%s3191_s3 + $0x68] sm:$0xff] }
 0x218   : > { %v2054_v25 = vpop.f32.mrf.mxu1  ;;  %v798_v7 = vpack.c.bf16 %v2361_v17, %v2365_v22  ;;  %v2340_v17 = vld [vmem:[#allocation4 + $0xc8] sm:$0xff]   ;;  %2160 = vmatprep.subr.mxu0 %v1366_v19  ;;  %v1363_v22 = vld [vmem:[%s3191_s3 + $0x60] sm:$0xff] }
 0x219   : > { %2378 = vtanh.f32 %v702_v23  ;;  %2088 = vmatprep.mubr.bf16.mxu0 %v797_v24  ;;  %v723_v34 = vadd.f32 %v2054_v25, %v2879_v31  ;;  %2124 = vmatprep.subr.bf16.mxu1 %v2340_v17  ;;  %v1362_v23 = vld [vmem:[%s3191_s3 + $0x58] sm:$0xff]  ;;  %v1361_v24 = vld [vmem:[%s3191_s3 + $0x50] sm:$0xff]  ;;  %v1360_v25 = vld [vmem:[%s3191_s3 + $0x48] sm:$0xff] }
 0x21a   : > { %2380 = vtanh.f32 %v707_v20  ;;  %v714_v26 = vpop.f32.mrf.mxu1  ;;  %2089 = vmatmul.mubr.bf16.gmra.mxu0 %v798_v7  ;;  %v2367_v28 = vpop.eup %2366  ;;  %v1365_v20 = vld [vmem:[%s3191_s3 + $0x70] sm:$0xff]  ;;  %v1359_v7 = vld [vmem:[%s3191_s3 + $0x40] sm:$0xff] }
 0x21b   : > { %v715_v27 = vadd.f32 %v2879_v31, %v714_v26  ;;  %2125 = vmatpush3.bf16.msra.mxu1 %v2340_v17  ;;  %2161 = vmatpush3.msra.mxu0 %v1366_v19  ;;  %v1358_v26 = vld [vmem:[%s3191_s3 + $0x38] sm:$0xff] }
 0x21c   : > { %v2055_v29 = vpop.f32.mrf.mxu1  ;;  %v2369_v30 = vpop.eup %2368  ;;  %2126 = vmatprep.subr.bf16.mxu1 %v2341_v18  ;;  %2162 = vmatprep.subr.mxu0 %v1365_v20 }
 0x21d   : > { %v726_v32 = vadd.f32 %v2055_v29, %v2879_v31  ;;  %2382 = vtanh.f32 %v715_v27  ;;  %2163 = vmatpush3.msra.mxu0 %v1365_v20  ;;  %v1357_v27 = vld [vmem:[%s3191_s3 + $0x30] sm:$0xff] }
 0x21e   : > { %v2371_v33 = vpop.eup %2370  ;;  %v717_v35 = vpop.f32.mrf.mxu1  ;;  %2164 = vmatprep.subr.mxu0 %v1364_v21 }
 0x21f   : > { %v2373_v36 = vpop.eup %2372  ;;  %v718_v37 = vadd.f32 %v2879_v31, %v717_v35  ;;  %v799_v38 = vpack.c.bf16 %v2371_v33, %v2367_v28  ;;  %2384 = vtanh.f32 %v726_v32  ;;  %2127 = vmatpush3.bf16.msra.mxu1 %v2341_v18  ;;  %2165 = vmatpush3.msra.mxu0 %v1364_v21  ;;  %v1356_v28 = vld [vmem:[%s3191_s3 + $0x28] sm:$0xff] }
 0x220   : > { %v2058_v39 = vpop.f32.mrf.mxu1  ;;  %v800_v40 = vpack.c.bf16 %v2369_v30, %v2373_v36  ;;  %2166 = vmatprep.subr.mxu0 %v1363_v22  ;;  %v2949_v30 = vld [vmem:[%s3190_s2 + $0x2] ss:$0 sm:$0xff] }
 0x221   : > { %2386 = vtanh.f32 %v718_v37  ;;  %2092 = vmatprep.mubr.bf16.mxu0 %v799_v38  ;;  %v739_v48 = vadd.f32 %v2058_v39, %v2879_v31  ;;  %2167 = vmatpush3.msra.mxu0 %v1363_v22 }
 0x222   : > { %2388 = vtanh.f32 %v723_v34  ;;  %v730_v41 = vpop.f32.mrf.mxu1  ;;  %2093 = vmatmul.mubr.bf16.gmra.mxu0 %v800_v40  ;;  %v2375_v43 = vpop.eup %2374  ;;  %2168 = vmatprep.subr.mxu0 %v1362_v23 }
 0x223   : > { %v731_v42 = vadd.f32 %v2879_v31, %v730_v41  ;;  %2169 = vmatpush3.msra.mxu0 %v1362_v23 }
 0x224   : > { %v2059_v44 = vpop.f32.mrf.mxu1  ;;  %v2377_v45 = vpop.eup %2376  ;;  %2170 = vmatprep.subr.mxu0 %v1361_v24 }
 0x225   : > { %v742_v46 = vadd.f32 %v2059_v44, %v2879_v31  ;;  %2390 = vtanh.f32 %v731_v42  ;;  %2171 = vmatpush3.msra.mxu0 %v1361_v24 }
 0x226   : > { %v2379_v47 = vpop.eup %2378  ;;  %v733_v49 = vpop.f32.mrf.mxu1  ;;  %2172 = vmatprep.subr.mxu0 %v1360_v25 }
 0x227   : > { %v2381_v50 = vpop.eup %2380  ;;  %v734_v51 = vadd.f32 %v2879_v31, %v733_v49  ;;  %v801_v52 = vpack.c.bf16 %v2379_v47, %v2375_v43  ;;  %2392 = vtanh.f32 %v742_v46  ;;  %2173 = vmatpush3.msra.mxu0 %v1360_v25 }
 0x228   : > { %v2062_v53 = vpop.f32.mrf.mxu1  ;;  %v802_v54 = vpack.c.bf16 %v2377_v45, %v2381_v50  ;;  %2174 = vmatprep.subr.mxu0 %v1359_v7 }
 0x229   : > { %2394 = vtanh.f32 %v734_v51  ;;  %2096 = vmatprep.mubr.bf16.mxu0 %v801_v52  ;;  %v755_v62 = vadd.f32 %v2062_v53, %v2879_v31  ;;  %2175 = vmatpush3.msra.mxu0 %v1359_v7 }
 0x22a   : > { %2396 = vtanh.f32 %v739_v48  ;;  %v746_v55 = vpop.f32.mrf.mxu1  ;;  %2097 = vmatmul.mubr.bf16.gmra.mxu0 %v802_v54  ;;  %v2383_v57 = vpop.eup %2382  ;;  %2176 = vmatprep.subr.mxu0 %v1358_v26 }
 0x22b   : > { %v747_v56 = vadd.f32 %v2879_v31, %v746_v55  ;;  %2177 = vmatpush3.msra.mxu0 %v1358_v26 }
 0x22c   : > { %v2063_v58 = vpop.f32.mrf.mxu1  ;;  %v2385_v59 = vpop.eup %2384  ;;  %2178 = vmatprep.subr.mxu0 %v1357_v27 }
 0x22d   : > { %v758_v60 = vadd.f32 %v2063_v58, %v2879_v31  ;;  %2398 = vtanh.f32 %v747_v56  ;;  %2179 = vmatpush3.msra.mxu0 %v1357_v27 }
 0x22e   : > { %v2387_v61 = vpop.eup %2386  ;;  %v749_v63 = vpop.f32.mrf.mxu1  ;;  %2180 = vmatprep.subr.mxu0 %v1356_v28 }
 0x22f   : > { %v2389_v0 = vpop.eup %2388  ;;  %v750_v1 = vadd.f32 %v2879_v31, %v749_v63  ;;  %v803_v2 = vpack.c.bf16 %v2387_v61, %v2383_v57  ;;  %2400 = vtanh.f32 %v758_v60  ;;  %2181 = vmatpush3.msra.mxu0 %v1356_v28 }
 0x230   : > { %v804_v4 = vpack.c.bf16 %v2385_v59, %v2389_v0 }
 0x231   : > { %2402 = vtanh.f32 %v750_v1  ;;  %2100 = vmatprep.mubr.bf16.mxu0 %v803_v2 }
 0x232   : > { %2404 = vtanh.f32 %v755_v62  ;;  %2101 = vmatmul.mubr.bf16.gmra.mxu0 %v804_v4  ;;  %v2391_v5 = vpop.eup %2390 }
 0x234   : > { %v2393_v6 = vpop.eup %2392 }
 0x236   : > { %v2395_v9 = vpop.eup %2394 }
 0x237   : > { %v2397_v10 = vpop.eup %2396  ;;  %v805_v11 = vpack.c.bf16 %v2395_v9, %v2391_v5 }
 0x238   : > { %v806_v3 = vpack.c.bf16 %v2393_v6, %v2397_v10 }
 0x239   : > { %2104 = vmatprep.mubr.bf16.mxu0 %v805_v11 }
 0x23a   : > { %2105 = vmatmul.mubr.bf16.gmra.mxu0 %v806_v3  ;;  %v2399_v8 = vpop.eup %2398 }
 0x23c   : > { %v2401_v12 = vpop.eup %2400 }
 0x23e   : > { %v2403_v13 = vpop.eup %2402 }
 0x23f   : > { %v2405_v14 = vpop.eup %2404  ;;  %v807_v31 = vpack.c.bf16 %v2403_v13, %v2399_v8 }
 0x240   : > { %v808_v15 = vpack.c.bf16 %v2401_v12, %v2405_v14 }
 0x241   : > { %2108 = vmatprep.mubr.bf16.mxu0 %v807_v31 }
 0x242   : > { %2109 = vmatmul.mubr.bf16.gmra.mxu0 %v808_v15 }
 0x2ca   : > { %v2082_v29 = vpop.f32.mrf.mxu0 }
 0x2cb   : > { %v922_v36 = vadd.f32 %v2082_v29, %v2949_v30 }
 0x2cc   : > { %v913_v32 = vpop.f32.mrf.mxu0 }
 0x2cd   : > { %v914_v33 = vadd.f32 %v2949_v30, %v913_v32 }
 0x2ce   : > { %v2083_v34 = vpop.f32.mrf.mxu0 }
 0x2cf   : > { %v925_v35 = vadd.f32 %v2083_v34, %v2949_v30  ;;  %2406 = vtanh.f32 %v914_v33 }
 0x2d0   : > { %v916_v37 = vpop.f32.mrf.mxu0 }
 0x2d1   : > { %v917_v38 = vadd.f32 %v2949_v30, %v916_v37  ;;  %2408 = vtanh.f32 %v925_v35 }
 0x2d2   : > { %v2086_v39 = vpop.f32.mrf.mxu0 }
 0x2d3   : > { %2410 = vtanh.f32 %v917_v38  ;;  %v938_v44 = vadd.f32 %v2086_v39, %v2949_v30 }
 0x2d4   : > { %2412 = vtanh.f32 %v922_v36  ;;  %v929_v40 = vpop.f32.mrf.mxu0 }
 0x2d5   : > { %v930_v41 = vadd.f32 %v2949_v30, %v929_v40 }
 0x2d6   : > { %v2087_v42 = vpop.f32.mrf.mxu0 }
 0x2d7   : > { %v941_v43 = vadd.f32 %v2087_v42, %v2949_v30  ;;  %2414 = vtanh.f32 %v930_v41 }
 0x2d8   : > { %v932_v45 = vpop.f32.mrf.mxu0 }
 0x2d9   : > { %v933_v46 = vadd.f32 %v2949_v30, %v932_v45  ;;  %2416 = vtanh.f32 %v941_v43 }
 0x2da   : > { %v2090_v47 = vpop.f32.mrf.mxu0 }
 0x2db   : > { %2418 = vtanh.f32 %v933_v46  ;;  %v954_v55 = vadd.f32 %v2090_v47, %v2949_v30 }
 0x2dc   : > { %2420 = vtanh.f32 %v938_v44  ;;  %v945_v48 = vpop.f32.mrf.mxu0  ;;  %v2407_v50 = vpop.eup %2406 }
 0x2dd   : > { %v946_v49 = vadd.f32 %v2949_v30, %v945_v48 }
 0x2de   : > { %v2091_v51 = vpop.f32.mrf.mxu0  ;;  %v2409_v52 = vpop.eup %2408 }
 0x2df   : > { %v957_v53 = vadd.f32 %v2091_v51, %v2949_v30  ;;  %2422 = vtanh.f32 %v946_v49 }
 0x2e0   : > { %v2411_v54 = vpop.eup %2410  ;;  %v948_v56 = vpop.f32.mrf.mxu0 }
 0x2e1   : > { %v2413_v57 = vpop.eup %2412  ;;  %v949_v58 = vadd.f32 %v2949_v30, %v948_v56  ;;  %v1072_v59 = vpack.c.bf16 %v2411_v54, %v2407_v50  ;;  %2424 = vtanh.f32 %v957_v53 }
 0x2e2   : > { %v2094_v60 = vpop.f32.mrf.mxu0  ;;  %v1073_v61 = vpack.c.bf16 %v2409_v52, %v2413_v57 }
 0x2e3   : > { %2426 = vtanh.f32 %v949_v58  ;;  %2128 = vmatprep.mubr.bf16.mxu1 %v1072_v59  ;;  %v970_v6 = vadd.f32 %v2094_v60, %v2949_v30 }
 0x2e4   : > { %2428 = vtanh.f32 %v954_v55  ;;  %v961_v62 = vpop.f32.mrf.mxu0  ;;  %2129 = vmatmul.mubr.bf16.vlgmr.msra.gmra.mxu1 %v1073_v61  ;;  %v2415_v0 = vpop.eup %2414 }
 0x2e5   : > { %v962_v63 = vadd.f32 %v2949_v30, %v961_v62 }
 0x2e6   : > { %v2095_v1 = vpop.f32.mrf.mxu0  ;;  %v2417_v2 = vpop.eup %2416 }
 0x2e7   : > { %v973_v4 = vadd.f32 %v2095_v1, %v2949_v30  ;;  %2430 = vtanh.f32 %v962_v63 }
 0x2e8   : > { %v2419_v5 = vpop.eup %2418  ;;  %v964_v9 = vpop.f32.mrf.mxu0 }
 0x2e9   : > { %v2421_v10 = vpop.eup %2420  ;;  %v965_v11 = vadd.f32 %v2949_v30, %v964_v9  ;;  %v1074_v3 = vpack.c.bf16 %v2419_v5, %v2415_v0  ;;  %2432 = vtanh.f32 %v973_v4 }
 0x2ea   : > { %v2098_v8 = vpop.f32.mrf.mxu0  ;;  %v1075_v12 = vpack.c.bf16 %v2417_v2, %v2421_v10 }
 0x2eb   : > { %2434 = vtanh.f32 %v965_v11  ;;  %2132 = vmatprep.mubr.bf16.mxu1 %v1074_v3  ;;  %v986_v19 = vadd.f32 %v2098_v8, %v2949_v30 }
 0x2ec   : > { %2436 = vtanh.f32 %v970_v6  ;;  %v977_v13 = vpop.f32.mrf.mxu0  ;;  %2133 = vmatmul.mubr.bf16.gmra.mxu1 %v1075_v12  ;;  %v2423_v31 = vpop.eup %2422 }
 0x2ed   : > { %v978_v14 = vadd.f32 %v2949_v30, %v977_v13 }
 0x2ee   : > { %v2099_v15 = vpop.f32.mrf.mxu0  ;;  %v2425_v16 = vpop.eup %2424 }
 0x2ef   : > { %v989_v17 = vadd.f32 %v2099_v15, %v2949_v30  ;;  %2438 = vtanh.f32 %v978_v14  ;;  %v1355_v15 = vld [vmem:[%s3191_s3 + $0x20] sm:$0xff] }
 0x2f0   : > { %v2427_v18 = vpop.eup %2426  ;;  %v980_v20 = vpop.f32.mrf.mxu0  ;;  %2182 = vmatprep.subr.mxu0 %v1355_v15 }
 0x2f1   : > { %v2429_v21 = vpop.eup %2428  ;;  %v981_v22 = vadd.f32 %v2949_v30, %v980_v20  ;;  %v1076_v23 = vpack.c.bf16 %v2427_v18, %v2423_v31  ;;  %2440 = vtanh.f32 %v989_v17  ;;  %2183 = vmatpush3.msra.mxu0 %v1355_v15  ;;  %v1353_v17 = vld [vmem:[%s3191_s3 + $0x10] sm:$0xff]  ;;  %v1352_v18 = vld [vmem:[%s3191_s3 + $0x8] sm:$0xff] }
 0x2f2   : > { %v2102_v24 = vpop.f32.mrf.mxu0  ;;  %v1077_v25 = vpack.c.bf16 %v2425_v16, %v2429_v21  ;;  %v1354_v16 = vld [vmem:[%s3191_s3 + $0x18] sm:$0xff]  ;;  %v3001_v21 = vld [vmem:[%s3190_s2 + $0x3] ss:$0 sm:$0xff] }
 0x2f3   : > { %2442 = vtanh.f32 %v981_v22  ;;  %2136 = vmatprep.mubr.bf16.mxu1 %v1076_v23  ;;  %v1002_v34 = vadd.f32 %v2102_v24, %v2949_v30  ;;  %2184 = vmatprep.subr.mxu0 %v1354_v16 }
 0x2f4   : > { %2444 = vtanh.f32 %v986_v19  ;;  %v993_v7 = vpop.f32.mrf.mxu0  ;;  %2137 = vmatmul.mubr.bf16.gmra.mxu1 %v1077_v25  ;;  %v2431_v27 = vpop.eup %2430  ;;  %2185 = vmatpush3.msra.mxu0 %v1354_v16  ;;  %v1351_v19 = vld [vmem:[%s3191_s3] sm:$0xff] }
 0x2f5   : > { %v994_v26 = vadd.f32 %v2949_v30, %v993_v7  ;;  %2186 = vmatprep.subr.mxu0 %v1353_v17 }
 0x2f6   : > { %v2103_v28 = vpop.f32.mrf.mxu0  ;;  %v2433_v29 = vpop.eup %2432  ;;  %2187 = vmatpush3.msra.mxu0 %v1353_v17 }
 0x2f7   : > { %v1005_v32 = vadd.f32 %v2103_v28, %v2949_v30  ;;  %2446 = vtanh.f32 %v994_v26  ;;  %2188 = vmatprep.subr.mxu0 %v1352_v18 }
 0x2f8   : > { %v2435_v33 = vpop.eup %2434  ;;  %v996_v35 = vpop.f32.mrf.mxu0  ;;  %2189 = vmatpush3.msra.mxu0 %v1352_v18 }
 0x2f9   : > { %v2437_v36 = vpop.eup %2436  ;;  %v997_v37 = vadd.f32 %v2949_v30, %v996_v35  ;;  %v1078_v38 = vpack.c.bf16 %v2435_v33, %v2431_v27  ;;  %2448 = vtanh.f32 %v1005_v32  ;;  %2190 = vmatprep.subr.mxu0 %v1351_v19 }
 0x2fa   : > { %v2106_v39 = vpop.f32.mrf.mxu0  ;;  %v1079_v40 = vpack.c.bf16 %v2433_v29, %v2437_v36  ;;  %2191 = vmatpush3.msra.mxu0 %v1351_v19 }
 0x2fb   : > { %2450 = vtanh.f32 %v997_v37  ;;  %2140 = vmatprep.mubr.bf16.mxu1 %v1078_v38  ;;  %v1018_v48 = vadd.f32 %v2106_v39, %v2949_v30 }
 0x2fc   : > { %2452 = vtanh.f32 %v1002_v34  ;;  %v1009_v41 = vpop.f32.mrf.mxu0  ;;  %2141 = vmatmul.mubr.bf16.gmra.mxu1 %v1079_v40  ;;  %v2439_v43 = vpop.eup %2438 }
 0x2fd   : > { %v1010_v42 = vadd.f32 %v2949_v30, %v1009_v41 }
 0x2fe   : > { %v2107_v44 = vpop.f32.mrf.mxu0  ;;  %v2441_v45 = vpop.eup %2440 }
 0x2ff   : > { %v1021_v46 = vadd.f32 %v2107_v44, %v2949_v30  ;;  %2454 = vtanh.f32 %v1010_v42 }
 0x300   : > { %v2443_v47 = vpop.eup %2442  ;;  %v1012_v49 = vpop.f32.mrf.mxu0 }
 0x301   : > { %v2445_v50 = vpop.eup %2444  ;;  %v1013_v51 = vadd.f32 %v2949_v30, %v1012_v49  ;;  %v1080_v52 = vpack.c.bf16 %v2443_v47, %v2439_v43  ;;  %2456 = vtanh.f32 %v1021_v46 }
 0x302   : > { %v2110_v53 = vpop.f32.mrf.mxu0  ;;  %v1081_v54 = vpack.c.bf16 %v2441_v45, %v2445_v50 }
 0x303   : > { %2458 = vtanh.f32 %v1013_v51  ;;  %2144 = vmatprep.mubr.bf16.mxu1 %v1080_v52  ;;  %v1034_v62 = vadd.f32 %v2110_v53, %v2949_v30 }
 0x304   : > { %2460 = vtanh.f32 %v1018_v48  ;;  %v1025_v55 = vpop.f32.mrf.mxu0  ;;  %2145 = vmatmul.mubr.bf16.gmra.mxu1 %v1081_v54  ;;  %v2447_v57 = vpop.eup %2446 }
 0x305   : > { %v1026_v56 = vadd.f32 %v2949_v30, %v1025_v55 }
 0x306   : > { %v2111_v58 = vpop.f32.mrf.mxu0  ;;  %v2449_v59 = vpop.eup %2448 }
 0x307   : > { %v1037_v60 = vadd.f32 %v2111_v58, %v2949_v30  ;;  %2462 = vtanh.f32 %v1026_v56 }
 0x308   : > { %v2451_v61 = vpop.eup %2450  ;;  %v1028_v63 = vpop.f32.mrf.mxu0 }
 0x309   : > { %v2453_v0 = vpop.eup %2452  ;;  %v1029_v1 = vadd.f32 %v2949_v30, %v1028_v63  ;;  %v1082_v2 = vpack.c.bf16 %v2451_v61, %v2447_v57  ;;  %2464 = vtanh.f32 %v1037_v60 }
 0x30a   : > { %v1083_v4 = vpack.c.bf16 %v2449_v59, %v2453_v0 }
 0x30b   : > { %2466 = vtanh.f32 %v1029_v1  ;;  %2148 = vmatprep.mubr.bf16.mxu1 %v1082_v2 }
 0x30c   : > { %2468 = vtanh.f32 %v1034_v62  ;;  %2149 = vmatmul.mubr.bf16.gmra.mxu1 %v1083_v4  ;;  %v2455_v5 = vpop.eup %2454 }
 0x30e   : > { %v2457_v6 = vpop.eup %2456 }
 0x310   : > { %v2459_v9 = vpop.eup %2458 }
 0x311   : > { %v2461_v10 = vpop.eup %2460  ;;  %v1084_v11 = vpack.c.bf16 %v2459_v9, %v2455_v5 }
 0x312   : > { %v1085_v3 = vpack.c.bf16 %v2457_v6, %v2461_v10 }
 0x313   : > { %2152 = vmatprep.mubr.bf16.mxu1 %v1084_v11 }
 0x314   : > { %2153 = vmatmul.mubr.bf16.gmra.mxu1 %v1085_v3  ;;  %v2463_v8 = vpop.eup %2462 }
 0x316   : > { %v2465_v12 = vpop.eup %2464 }
 0x318   : > { %v2467_v13 = vpop.eup %2466 }
 0x319   : > { %v2469_v14 = vpop.eup %2468  ;;  %v1086_v30 = vpack.c.bf16 %v2467_v13, %v2463_v8 }
 0x31a   : > { %v1087_v31 = vpack.c.bf16 %v2465_v12, %v2469_v14 }
 0x31b   : > { %2156 = vmatprep.mubr.bf16.mxu1 %v1086_v30 }
 0x31c   : > { %2157 = vmatmul.mubr.bf16.gmra.mxu1 %v1087_v31 }
 0x3a4   : > { %v2130_v20 = vpop.f32.mrf.mxu1 }
 0x3a5   : > { %v1201_v25 = vadd.f32 %v2130_v20, %v3001_v21 }
 0x3a6   : > { %v1192_v22 = vpop.f32.mrf.mxu1 }
 0x3a7   : > { %v1193_v23 = vadd.f32 %v3001_v21, %v1192_v22 }
 0x3a8   : > { %v2131_v24 = vpop.f32.mrf.mxu1 }
 0x3a9   : > { %2470 = vtanh.f32 %v1193_v23  ;;  %v1204_v27 = vadd.f32 %v2131_v24, %v3001_v21 }
 0x3aa   : > { %v1195_v7 = vpop.f32.mrf.mxu1 }
 0x3ab   : > { %v1196_v26 = vadd.f32 %v3001_v21, %v1195_v7 }
 0x3ac   : > { %v2134_v28 = vpop.f32.mrf.mxu1 }
 0x3ad   : > { %2472 = vtanh.f32 %v1196_v26  ;;  %v1217_v34 = vadd.f32 %v2134_v28, %v3001_v21 }
 0x3ae   : > { %2474 = vtanh.f32 %v1201_v25  ;;  %v1208_v29 = vpop.f32.mrf.mxu1 }
 0x3af   : > { %v1209_v32 = vadd.f32 %v3001_v21, %v1208_v29  ;;  %2476 = vtanh.f32 %v1204_v27 }
 0x3b0   : > { %v2135_v33 = vpop.f32.mrf.mxu1 }
 0x3b1   : > { %2478 = vtanh.f32 %v1209_v32  ;;  %v1220_v37 = vadd.f32 %v2135_v33, %v3001_v21 }
 0x3b2   : > { %v1211_v35 = vpop.f32.mrf.mxu1 }
 0x3b3   : > { %v1212_v36 = vadd.f32 %v3001_v21, %v1211_v35 }
 0x3b4   : > { %v2138_v38 = vpop.f32.mrf.mxu1 }
 0x3b5   : > { %2480 = vtanh.f32 %v1212_v36  ;;  %v1233_v44 = vadd.f32 %v2138_v38, %v3001_v21 }
 0x3b6   : > { %v2471_v39 = vpop.eup %2470  ;;  %2482 = vtanh.f32 %v1217_v34  ;;  %v1224_v40 = vpop.f32.mrf.mxu1 }
 0x3b7   : > { %v1225_v41 = vadd.f32 %v3001_v21, %v1224_v40  ;;  %2192 = vmatprep.mubr.f32.mxu0 %v2471_v39  ;;  %2484 = vtanh.f32 %v1220_v37 }
 0x3b8   : > { %v2139_v42 = vpop.f32.mrf.mxu1 }
 0x3b9   : > { %2486 = vtanh.f32 %v1225_v41  ;;  %v1236_v48 = vadd.f32 %v2139_v42, %v3001_v21 }
 0x3ba   : > { %v2473_v43 = vpop.eup %2472  ;;  %v1227_v45 = vpop.f32.mrf.mxu1 }
 0x3bb   : > { %v2475_v46 = vpop.eup %2474  ;;  %v1228_v47 = vadd.f32 %v3001_v21, %v1227_v45  ;;  %2193 = vmatmul.mubr.f32.vlgmr.msra.gmra.mxu0 %v2473_v43 }
 0x3bc   : > { %v2142_v49 = vpop.f32.mrf.mxu1  ;;  %2195 = vmatprep.mubr.f32.mxu0 %v2475_v46  ;;  %v2477_v50 = vpop.eup %2476 }
 0x3bd   : > { %2488 = vtanh.f32 %v1228_v47  ;;  %v1249_v56 = vadd.f32 %v2142_v49, %v3001_v21 }
 0x3be   : > { %v2479_v51 = vpop.eup %2478  ;;  %2490 = vtanh.f32 %v1233_v44  ;;  %v1240_v52 = vpop.f32.mrf.mxu1 }
 0x3bf   : > { %v1241_v53 = vadd.f32 %v3001_v21, %v1240_v52  ;;  %2196 = vmatmul.mubr.f32.gmra.mxu0 %v2477_v50  ;;  %2492 = vtanh.f32 %v1236_v48 }
 0x3c0   : > { %v2143_v54 = vpop.f32.mrf.mxu1  ;;  %2198 = vmatprep.mubr.f32.mxu0 %v2479_v51 }
 0x3c1   : > { %2494 = vtanh.f32 %v1241_v53  ;;  %v1252_v60 = vadd.f32 %v2143_v54, %v3001_v21  ;;  %v3040_v54 = vld [vmem:[%s3190_s2 + $0x4] ss:$0 sm:$0xff] }
 0x3c2   : > { %v2481_v55 = vpop.eup %2480  ;;  %v1243_v57 = vpop.f32.mrf.mxu1 }
 0x3c3   : > { %v2483_v58 = vpop.eup %2482  ;;  %v1244_v59 = vadd.f32 %v3001_v21, %v1243_v57  ;;  %2199 = vmatmul.mubr.f32.gmra.mxu0 %v2481_v55 }
 0x3c4   : > { %v2146_v61 = vpop.f32.mrf.mxu1  ;;  %2201 = vmatprep.mubr.f32.mxu0 %v2483_v58  ;;  %v2485_v62 = vpop.eup %2484  ;;  %v2534_v58 = vld [vmem:[%s2794_s29 + $0x8] sm:$0xff] }
 0x3c5   : > { %2496 = vtanh.f32 %v1244_v59  ;;  %v1265_v5 = vadd.f32 %v2146_v61, %v3001_v21 }
 0x3c6   : > { %v2487_v63 = vpop.eup %2486  ;;  %2498 = vtanh.f32 %v1249_v56  ;;  %v1256_v0 = vpop.f32.mrf.mxu1 }
 0x3c7   : > { %v1257_v1 = vadd.f32 %v3001_v21, %v1256_v0  ;;  %2202 = vmatmul.mubr.f32.gmra.mxu0 %v2485_v62  ;;  %2500 = vtanh.f32 %v1252_v60 }
 0x3c8   : > { %v2147_v2 = vpop.f32.mrf.mxu1  ;;  %2204 = vmatprep.mubr.f32.mxu0 %v2487_v63  ;;  %v2535_v63 = vld [vmem:[%s2794_s29] sm:$0xff] }
 0x3c9   : > { %2502 = vtanh.f32 %v1257_v1  ;;  %v1268_v11 = vadd.f32 %v2147_v2, %v3001_v21 }
 0x3ca   : > { %v2489_v4 = vpop.eup %2488  ;;  %v1259_v6 = vpop.f32.mrf.mxu1 }
 0x3cb   : > { %v2491_v9 = vpop.eup %2490  ;;  %v1260_v10 = vadd.f32 %v3001_v21, %v1259_v6  ;;  %2205 = vmatmul.mubr.f32.gmra.mxu0 %v2489_v4 }
 0x3cc   : > { %v2150_v3 = vpop.f32.mrf.mxu1  ;;  %2207 = vmatprep.mubr.f32.mxu0 %v2491_v9  ;;  %v2493_v8 = vpop.eup %2492 }
 0x3cd   : > { %2504 = vtanh.f32 %v1260_v10  ;;  %v1281_v15 = vadd.f32 %v2150_v3, %v3001_v21  ;;  %v2537_v3 = vld [vmem:[%s2794_s29 + $0x10] sm:$0xff] }
 0x3ce   : > { %v2495_v12 = vpop.eup %2494  ;;  %2506 = vtanh.f32 %v1265_v5  ;;  %v1272_v13 = vpop.f32.mrf.mxu1  ;;  %v2536_v5 = vld [vmem:[%s2794_s29 + $0x18] sm:$0xff] }
 0x3cf   : > { %v1273_v14 = vadd.f32 %v3001_v21, %v1272_v13  ;;  %2208 = vmatmul.mubr.f32.gmra.mxu0 %v2493_v8  ;;  %2508 = vtanh.f32 %v1268_v11 }
 0x3d0   : > { %v2151_v30 = vpop.f32.mrf.mxu1  ;;  %2210 = vmatprep.mubr.f32.mxu0 %v2495_v12 }
 0x3d1   : > { %2510 = vtanh.f32 %v1273_v14  ;;  %v1284_v19 = vadd.f32 %v2151_v30, %v3001_v21  ;;  %v2538_v30 = vld [vmem:[%s2794_s29 + $0x28] sm:$0xff] }
 0x3d2   : > { %v2497_v31 = vpop.eup %2496  ;;  %v1275_v16 = vpop.f32.mrf.mxu1 }
 0x3d3   : > { %v2499_v17 = vpop.eup %2498  ;;  %v1276_v18 = vadd.f32 %v3001_v21, %v1275_v16  ;;  %2211 = vmatmul.mubr.f32.gmra.mxu0 %v2497_v31 }
 0x3d4   : > { %v2154_v20 = vpop.f32.mrf.mxu1  ;;  %2213 = vmatprep.mubr.f32.mxu0 %v2499_v17  ;;  %v2501_v22 = vpop.eup %2500 }
 0x3d5   : > { %2512 = vtanh.f32 %v1276_v18  ;;  %v1297_v27 = vadd.f32 %v2154_v20, %v3001_v21  ;;  %v2539_v18 = vld [vmem:[%s2794_s29 + $0x20] sm:$0xff] }
 0x3d6   : > { %v2503_v23 = vpop.eup %2502  ;;  %2514 = vtanh.f32 %v1281_v15  ;;  %v1288_v24 = vpop.f32.mrf.mxu1 }
 0x3d7   : > { %v1289_v25 = vadd.f32 %v3001_v21, %v1288_v24  ;;  %2214 = vmatmul.mubr.f32.gmra.mxu0 %v2501_v22  ;;  %2516 = vtanh.f32 %v1284_v19  ;;  %v2540_v24 = vld [vmem:[%s2794_s29 + $0x38] sm:$0xff] }
 0x3d8   : > { %v2155_v7 = vpop.f32.mrf.mxu1  ;;  %2216 = vmatprep.mubr.f32.mxu0 %v2503_v23 }
 0x3d9   : > { %2518 = vtanh.f32 %v1289_v25  ;;  %v1300_v33 = vadd.f32 %v2155_v7, %v3001_v21 }
 0x3da   : > { %v2505_v26 = vpop.eup %2504  ;;  %v1291_v28 = vpop.f32.mrf.mxu1 }
 0x3db   : > { %v2507_v29 = vpop.eup %2506  ;;  %v1292_v32 = vadd.f32 %v3001_v21, %v1291_v28  ;;  %2217 = vmatmul.mubr.f32.gmra.mxu0 %v2505_v26  ;;  %v2541_v28 = vld [vmem:[%s2794_s29 + $0x30] sm:$0xff] }
 0x3dc   : > { %v2158_v34 = vpop.f32.mrf.mxu1  ;;  %2219 = vmatprep.mubr.f32.mxu0 %v2507_v29  ;;  %v2509_v35 = vpop.eup %2508 }
 0x3dd   : > { %2520 = vtanh.f32 %v1292_v32  ;;  %v1313_v41 = vadd.f32 %v2158_v34, %v3001_v21 }
 0x3de   : > { %v2511_v36 = vpop.eup %2510  ;;  %2522 = vtanh.f32 %v1297_v27  ;;  %v1304_v37 = vpop.f32.mrf.mxu1 }
 0x3df   : > { %v1305_v38 = vadd.f32 %v3001_v21, %v1304_v37  ;;  %2220 = vmatmul.mubr.f32.gmra.mxu0 %v2509_v35  ;;  %2524 = vtanh.f32 %v1300_v33  ;;  %v2542_v35 = vld [vmem:[%s2794_s29 + $0x48] sm:$0xff] }
 0x3e0   : > { %v2159_v39 = vpop.f32.mrf.mxu1  ;;  %2222 = vmatprep.mubr.f32.mxu0 %v2511_v36 }
 0x3e1   : > { %2526 = vtanh.f32 %v1305_v38  ;;  %v1316_v46 = vadd.f32 %v2159_v39, %v3001_v21 }
 0x3e2   : > { %v2513_v40 = vpop.eup %2512  ;;  %v1307_v42 = vpop.f32.mrf.mxu1 }
 0x3e3   : > { %v2515_v43 = vpop.eup %2514  ;;  %v1308_v44 = vadd.f32 %v3001_v21, %v1307_v42  ;;  %2223 = vmatmul.mubr.f32.gmra.mxu0 %v2513_v40  ;;  %v2543_v40 = vld [vmem:[%s2794_s29 + $0x40] sm:$0xff] }
 0x3e4   : > { %2225 = vmatprep.mubr.f32.mxu0 %v2515_v43  ;;  %v2517_v45 = vpop.eup %2516 }
 0x3e5   : > { %2528 = vtanh.f32 %v1308_v44 }
 0x3e6   : > { %v2519_v47 = vpop.eup %2518  ;;  %2530 = vtanh.f32 %v1313_v41 }
 0x3e7   : > { %2226 = vmatmul.mubr.f32.gmra.mxu0 %v2517_v45  ;;  %2532 = vtanh.f32 %v1316_v46  ;;  %v2544_v45 = vld [vmem:[%s2794_s29 + $0x58] sm:$0xff] }
 0x3e8   : > { %2228 = vmatprep.mubr.f32.mxu0 %v2519_v47 }
 0x3ea   : > { %v2521_v48 = vpop.eup %2520 }
 0x3eb   : > { %v2523_v49 = vpop.eup %2522  ;;  %2229 = vmatmul.mubr.f32.gmra.mxu0 %v2521_v48 }
 0x3ec   : > { %2231 = vmatprep.mubr.f32.mxu0 %v2523_v49  ;;  %v2525_v50 = vpop.eup %2524 }
 0x3ee   : > { %v2527_v51 = vpop.eup %2526 }
 0x3ef   : > { %2232 = vmatmul.mubr.f32.gmra.mxu0 %v2525_v50  ;;  %v2545_v50 = vld [vmem:[%s2794_s29 + $0x50] sm:$0xff] }
 0x3f0   : > { %2234 = vmatprep.mubr.f32.mxu0 %v2527_v51 }
 0x3f2   : > { %v2529_v52 = vpop.eup %2528 }
 0x3f3   : > { %v2531_v53 = vpop.eup %2530  ;;  %2235 = vmatmul.mubr.f32.gmra.mxu0 %v2529_v52 }
 0x3f4   : > { %2237 = vmatprep.mubr.f32.mxu0 %v2531_v53  ;;  %v2533_v21 = vpop.eup %2532 }
 0x3f7   : > { %2238 = vmatmul.mubr.f32.gmra.mxu0 %v2533_v21 }
 0x47b   : > { %v2194_v55 = vpop.f32.mrf.mxu0 }
 0x47c   : > { %v1444_v56 = vadd.f32 %v2194_v55, %v3040_v54  ;;  %v2546_v55 = vld [vmem:[%s2794_s29 + $0x68] sm:$0xff] }
 0x47d   : > { %v1438_v57 = vpop.f32.mrf.mxu0 }
 0x47e   : > { %v1598_v59 = vmul.f32 %v2534_v58, %v1444_v56  ;;  %v1439_v60 = vadd.f32 %v3040_v54, %v1438_v57 }
 0x47f   : > { %v2197_v61 = vpop.f32.mrf.mxu0 }
 0x480   : > { %v1630_v62 = vadd.f32 %v2534_v58, %v1598_v59  ;;  %v1597_v0 = vmul.f32 %v2535_v63, %v1439_v60  ;;  %v1454_v1 = vadd.f32 %v2197_v61, %v3040_v54  ;;  %v2547_v60 = vld [vmem:[%s2794_s29 + $0x60] sm:$0xff] }
 0x481   : > { %v1448_v2 = vpop.f32.mrf.mxu0 }
 0x482   : > { %1663 = vst.msk [vmem:[%s3048_s19 + $0x8] sm:$0xff] %vm1661_vm0, %v1630_v62  ;;  %v1629_v4 = vadd.f32 %v2535_v63, %v1597_v0  ;;  %v1600_v6 = vmul.f32 %v2536_v5, %v1454_v1  ;;  %v1449_v9 = vadd.f32 %v3040_v54, %v1448_v2  ;;  %v2548_v1 = vld [vmem:[%s2794_s29 + $0x78] sm:$0xff] }
 0x483   : > { %v2200_v10 = vpop.f32.mrf.mxu0 }
 0x484   : > { %1662 = vst.msk [vmem:[%s3048_s19] sm:$0xff] %vm1661_vm0, %v1629_v4  ;;  %v1632_v11 = vadd.f32 %v2536_v5, %v1600_v6  ;;  %v1599_v8 = vmul.f32 %v2537_v3, %v1449_v9  ;;  %v1464_v12 = vadd.f32 %v2200_v10, %v3040_v54  ;;  %v2549_v9 = vld [vmem:[%s2794_s29 + $0x70] sm:$0xff] }
 0x485   : > { %v1458_v13 = vpop.f32.mrf.mxu0 }
 0x486   : > { %1665 = vst.msk [vmem:[%s3048_s19 + $0x18] sm:$0xff] %vm1661_vm0, %v1632_v11  ;;  %v1631_v14 = vadd.f32 %v2537_v3, %v1599_v8  ;;  %v1602_v31 = vmul.f32 %v2538_v30, %v1464_v12  ;;  %v1459_v15 = vadd.f32 %v3040_v54, %v1458_v13  ;;  %v2550_v12 = vld [vmem:[%s2794_s29 + $0x88] sm:$0xff] }
 0x487   : > { %v2203_v16 = vpop.f32.mrf.mxu0 }
 0x488   : > { %1664 = vst.msk [vmem:[%s3048_s19 + $0x10] sm:$0xff] %vm1661_vm0, %v1631_v14  ;;  %v1634_v17 = vadd.f32 %v2538_v30, %v1602_v31  ;;  %v1601_v19 = vmul.f32 %v2539_v18, %v1459_v15  ;;  %v1474_v20 = vadd.f32 %v2203_v16, %v3040_v54  ;;  %v2551_v15 = vld [vmem:[%s2794_s29 + $0x80] sm:$0xff] }
 0x489   : > { %v1468_v22 = vpop.f32.mrf.mxu0 }
 0x48a   : > { %1667 = vst.msk [vmem:[%s3048_s19 + $0x28] sm:$0xff] %vm1661_vm0, %v1634_v17  ;;  %v1633_v23 = vadd.f32 %v2539_v18, %v1601_v19  ;;  %v1604_v25 = vmul.f32 %v2540_v24, %v1474_v20  ;;  %v1469_v7 = vadd.f32 %v3040_v54, %v1468_v22  ;;  %v2552_v20 = vld [vmem:[%s2794_s29 + $0x98] sm:$0xff] }
 0x48b   : > { %v2206_v26 = vpop.f32.mrf.mxu0 }
 0x48c   : > { %1666 = vst.msk [vmem:[%s3048_s19 + $0x20] sm:$0xff] %vm1661_vm0, %v1633_v23  ;;  %v1636_v27 = vadd.f32 %v2540_v24, %v1604_v25  ;;  %v1603_v29 = vmul.f32 %v2541_v28, %v1469_v7  ;;  %v1484_v32 = vadd.f32 %v2206_v26, %v3040_v54  ;;  %v2553_v7 = vld [vmem:[%s2794_s29 + $0x90] sm:$0xff] }
 0x48d   : > { %v1478_v33 = vpop.f32.mrf.mxu0 }
 0x48e   : > { %1669 = vst.msk [vmem:[%s3048_s19 + $0x38] sm:$0xff] %vm1661_vm0, %v1636_v27  ;;  %v1635_v34 = vadd.f32 %v2541_v28, %v1603_v29  ;;  %v1606_v36 = vmul.f32 %v2542_v35, %v1484_v32  ;;  %v1479_v37 = vadd.f32 %v3040_v54, %v1478_v33  ;;  %v2554_v32 = vld [vmem:[%s2794_s29 + $0xa8] sm:$0xff] }
 0x48f   : > { %v2209_v38 = vpop.f32.mrf.mxu0 }
 0x490   : > { %1668 = vst.msk [vmem:[%s3048_s19 + $0x30] sm:$0xff] %vm1661_vm0, %v1635_v34  ;;  %v1638_v39 = vadd.f32 %v2542_v35, %v1606_v36  ;;  %v1605_v41 = vmul.f32 %v2543_v40, %v1479_v37  ;;  %v1494_v42 = vadd.f32 %v2209_v38, %v3040_v54  ;;  %v2555_v37 = vld [vmem:[%s2794_s29 + $0xa0] sm:$0xff] }
 0x491   : > { %v1488_v43 = vpop.f32.mrf.mxu0 }
 0x492   : > { %1671 = vst.msk [vmem:[%s3048_s19 + $0x48] sm:$0xff] %vm1661_vm0, %v1638_v39  ;;  %v1637_v44 = vadd.f32 %v2543_v40, %v1605_v41  ;;  %v1608_v46 = vmul.f32 %v2544_v45, %v1494_v42  ;;  %v1489_v47 = vadd.f32 %v3040_v54, %v1488_v43  ;;  %v2556_v42 = vld [vmem:[%s2794_s29 + $0xb8] sm:$0xff] }
 0x493   : > { %v2212_v48 = vpop.f32.mrf.mxu0 }
 0x494   : > { %1670 = vst.msk [vmem:[%s3048_s19 + $0x40] sm:$0xff] %vm1661_vm0, %v1637_v44  ;;  %v1640_v49 = vadd.f32 %v2544_v45, %v1608_v46  ;;  %v1607_v51 = vmul.f32 %v2545_v50, %v1489_v47  ;;  %v1504_v52 = vadd.f32 %v2212_v48, %v3040_v54  ;;  %v2557_v47 = vld [vmem:[%s2794_s29 + $0xb0] sm:$0xff] }
 0x495   : > { %v1498_v53 = vpop.f32.mrf.mxu0 }
 0x496   : > { %1673 = vst.msk [vmem:[%s3048_s19 + $0x58] sm:$0xff] %vm1661_vm0, %v1640_v49  ;;  %v1639_v21 = vadd.f32 %v2545_v50, %v1607_v51  ;;  %v1610_v56 = vmul.f32 %v2546_v55, %v1504_v52  ;;  %v1499_v57 = vadd.f32 %v3040_v54, %v1498_v53  ;;  %v2558_v52 = vld [vmem:[%s2794_s29 + $0xc8] sm:$0xff] }
 0x497   : > { %v2215_v58 = vpop.f32.mrf.mxu0 }
 0x498   : > { %1672 = vst.msk [vmem:[%s3048_s19 + $0x50] sm:$0xff] %vm1661_vm0, %v1639_v21  ;;  %v1642_v59 = vadd.f32 %v2546_v55, %v1610_v56  ;;  %v1609_v61 = vmul.f32 %v2547_v60, %v1499_v57  ;;  %v1514_v62 = vadd.f32 %v2215_v58, %v3040_v54  ;;  %v2559_v57 = vld [vmem:[%s2794_s29 + $0xc0] sm:$0xff] }
 0x499   : > { %v1508_v63 = vpop.f32.mrf.mxu0 }
 0x49a   : > { %1675 = vst.msk [vmem:[%s3048_s19 + $0x68] sm:$0xff] %vm1661_vm0, %v1642_v59  ;;  %v1641_v0 = vadd.f32 %v2547_v60, %v1609_v61  ;;  %v1612_v2 = vmul.f32 %v2548_v1, %v1514_v62  ;;  %v1509_v4 = vadd.f32 %v3040_v54, %v1508_v63  ;;  %v2560_v62 = vld [vmem:[%s2794_s29 + $0xd8] sm:$0xff] }
 0x49b   : > { %v2218_v5 = vpop.f32.mrf.mxu0 }
 0x49c   : > { %1674 = vst.msk [vmem:[%s3048_s19 + $0x60] sm:$0xff] %vm1661_vm0, %v1641_v0  ;;  %v1644_v6 = vadd.f32 %v2548_v1, %v1612_v2  ;;  %v1611_v10 = vmul.f32 %v2549_v9, %v1509_v4  ;;  %v1524_v11 = vadd.f32 %v2218_v5, %v3040_v54  ;;  %v2561_v4 = vld [vmem:[%s2794_s29 + $0xd0] sm:$0xff] }
 0x49d   : > { %v1518_v3 = vpop.f32.mrf.mxu0 }
 0x49e   : > { %1677 = vst.msk [vmem:[%s3048_s19 + $0x78] sm:$0xff] %vm1661_vm0, %v1644_v6  ;;  %v1643_v8 = vadd.f32 %v2549_v9, %v1611_v10  ;;  %v1614_v13 = vmul.f32 %v2550_v12, %v1524_v11  ;;  %v1519_v14 = vadd.f32 %v3040_v54, %v1518_v3  ;;  %v2562_v11 = vld [vmem:[%s2794_s29 + $0xe8] sm:$0xff] }
 0x49f   : > { %v2221_v30 = vpop.f32.mrf.mxu0 }
 0x4a0   : > { %1676 = vst.msk [vmem:[%s3048_s19 + $0x70] sm:$0xff] %vm1661_vm0, %v1643_v8  ;;  %v1646_v31 = vadd.f32 %v2550_v12, %v1614_v13  ;;  %v1613_v16 = vmul.f32 %v2551_v15, %v1519_v14  ;;  %v1534_v17 = vadd.f32 %v2221_v30, %v3040_v54  ;;  %v2563_v14 = vld [vmem:[%s2794_s29 + $0xe0] sm:$0xff] }
 0x4a1   : > { %v1528_v18 = vpop.f32.mrf.mxu0 }
 0x4a2   : > { %1679 = vst.msk [vmem:[%s3048_s19 + $0x88] sm:$0xff] %vm1661_vm0, %v1646_v31  ;;  %v1645_v19 = vadd.f32 %v2551_v15, %v1613_v16  ;;  %v1616_v22 = vmul.f32 %v2552_v20, %v1534_v17  ;;  %v1529_v23 = vadd.f32 %v3040_v54, %v1528_v18  ;;  %v2564_v17 = vld [vmem:[%s2794_s29 + $0xf8] sm:$0xff] }
 0x4a3   : > { %v2224_v24 = vpop.f32.mrf.mxu0 }
 0x4a4   : > { %1678 = vst.msk [vmem:[%s3048_s19 + $0x80] sm:$0xff] %vm1661_vm0, %v1645_v19  ;;  %v1648_v25 = vadd.f32 %v2552_v20, %v1616_v22  ;;  %v1615_v26 = vmul.f32 %v2553_v7, %v1529_v23  ;;  %v1544_v27 = vadd.f32 %v2224_v24, %v3040_v54  ;;  %v2565_v22 = vld [vmem:[%s2794_s29 + $0xf0] sm:$0xff] }
 0x4a5   : > { %v1538_v28 = vpop.f32.mrf.mxu0 }
 0x4a6   : > { %1681 = vst.msk [vmem:[%s3048_s19 + $0x98] sm:$0xff] %vm1661_vm0, %v1648_v25  ;;  %v1647_v29 = vadd.f32 %v2553_v7, %v1615_v26  ;;  %v1618_v33 = vmul.f32 %v2554_v32, %v1544_v27  ;;  %v1539_v34 = vadd.f32 %v3040_v54, %v1538_v28 }
 0x4a7   : > { %v2227_v35 = vpop.f32.mrf.mxu0 }
 0x4a8   : > { %1680 = vst.msk [vmem:[%s3048_s19 + $0x90] sm:$0xff] %vm1661_vm0, %v1647_v29  ;;  %v1650_v36 = vadd.f32 %v2554_v32, %v1618_v33  ;;  %v1617_v38 = vmul.f32 %v2555_v37, %v1539_v34  ;;  %v1554_v39 = vadd.f32 %v2227_v35, %v3040_v54 }
 0x4a9   : > { %v1548_v40 = vpop.f32.mrf.mxu0 }
 0x4aa   : > { %1683 = vst.msk [vmem:[%s3048_s19 + $0xa8] sm:$0xff] %vm1661_vm0, %v1650_v36  ;;  %v1649_v41 = vadd.f32 %v2555_v37, %v1617_v38  ;;  %v1620_v43 = vmul.f32 %v2556_v42, %v1554_v39  ;;  %v1549_v44 = vadd.f32 %v3040_v54, %v1548_v40 }
 0x4ab   : > { %v2230_v45 = vpop.f32.mrf.mxu0 }
 0x4ac   : > { %1682 = vst.msk [vmem:[%s3048_s19 + $0xa0] sm:$0xff] %vm1661_vm0, %v1649_v41  ;;  %v1652_v46 = vadd.f32 %v2556_v42, %v1620_v43  ;;  %v1619_v48 = vmul.f32 %v2557_v47, %v1549_v44  ;;  %v1564_v49 = vadd.f32 %v2230_v45, %v3040_v54 }
 0x4ad   : > { %v1558_v50 = vpop.f32.mrf.mxu0 }
 0x4ae   : > { %1685 = vst.msk [vmem:[%s3048_s19 + $0xb8] sm:$0xff] %vm1661_vm0, %v1652_v46  ;;  %v1651_v51 = vadd.f32 %v2557_v47, %v1619_v48  ;;  %v1622_v53 = vmul.f32 %v2558_v52, %v1564_v49  ;;  %v1559_v21 = vadd.f32 %v3040_v54, %v1558_v50 }
 0x4af   : > { %v2233_v55 = vpop.f32.mrf.mxu0 }
 0x4b0   : > { %1684 = vst.msk [vmem:[%s3048_s19 + $0xb0] sm:$0xff] %vm1661_vm0, %v1651_v51  ;;  %v1654_v56 = vadd.f32 %v2558_v52, %v1622_v53  ;;  %v1621_v58 = vmul.f32 %v2559_v57, %v1559_v21  ;;  %v1574_v59 = vadd.f32 %v2233_v55, %v3040_v54 }
 0x4b1   : > { %v1568_v60 = vpop.f32.mrf.mxu0 }
 0x4b2   : > { %1687 = vst.msk [vmem:[%s3048_s19 + $0xc8] sm:$0xff] %vm1661_vm0, %v1654_v56  ;;  %v1653_v61 = vadd.f32 %v2559_v57, %v1621_v58  ;;  %v1624_v63 = vmul.f32 %v2560_v62, %v1574_v59  ;;  %v1569_v0 = vadd.f32 %v3040_v54, %v1568_v60 }
 0x4b3   : > { %v2236_v1 = vpop.f32.mrf.mxu0 }
 0x4b4   : > { %1686 = vst.msk [vmem:[%s3048_s19 + $0xc0] sm:$0xff] %vm1661_vm0, %v1653_v61  ;;  %v1656_v2 = vadd.f32 %v2560_v62, %v1624_v63  ;;  %v1623_v5 = vmul.f32 %v2561_v4, %v1569_v0  ;;  %v1584_v6 = vadd.f32 %v2236_v1, %v3040_v54 }
 0x4b5   : > { %v1578_v9 = vpop.f32.mrf.mxu0 }
 0x4b6   : > { %1689 = vst.msk [vmem:[%s3048_s19 + $0xd8] sm:$0xff] %vm1661_vm0, %v1656_v2  ;;  %v1655_v10 = vadd.f32 %v2561_v4, %v1623_v5  ;;  %v1626_v3 = vmul.f32 %v2562_v11, %v1584_v6  ;;  %v1579_v8 = vadd.f32 %v3040_v54, %v1578_v9 }
 0x4b7   : > { %v2239_v12 = vpop.f32.mrf.mxu0 }
 0x4b8   : > { %1688 = vst.msk [vmem:[%s3048_s19 + $0xd0] sm:$0xff] %vm1661_vm0, %v1655_v10  ;;  %v1658_v13 = vadd.f32 %v2562_v11, %v1626_v3  ;;  %v1625_v30 = vmul.f32 %v2563_v14, %v1579_v8  ;;  %v1594_v31 = vadd.f32 %v2239_v12, %v3040_v54 }
 0x4b9   : > { %v1588_v15 = vpop.f32.mrf.mxu0 }
 0x4ba   : > { %1691 = vst.msk [vmem:[%s3048_s19 + $0xe8] sm:$0xff] %vm1661_vm0, %v1658_v13  ;;  %v1657_v16 = vadd.f32 %v2563_v14, %v1625_v30  ;;  %v1628_v18 = vmul.f32 %v2564_v17, %v1594_v31  ;;  %v1589_v19 = vadd.f32 %v3040_v54, %v1588_v15 }
 0x4bc   : > { %1690 = vst.msk [vmem:[%s3048_s19 + $0xe0] sm:$0xff] %vm1661_vm0, %v1657_v16  ;;  %v1660_v20 = vadd.f32 %v2564_v17, %v1628_v18  ;;  %v1627_v23 = vmul.f32 %v2565_v22, %v1589_v19 }
 0x4be   : > { %1693 = vst.msk [vmem:[%s3048_s19 + $0xf8] sm:$0xff] %vm1661_vm0, %v1660_v20  ;;  %v1659_v24 = vadd.f32 %v2565_v22, %v1627_v23 }
 0x4c0   : > { %1692 = vst.msk [vmem:[%s3048_s19 + $0xf0] sm:$0xff] %vm1661_vm0, %v1659_v24 }
 0x4c1 PF: > { %p15_p7 = scmp.ge.s32.totalorder %s2738_s26, 4   ;;  %s3205_s15 = smov %s2650_s16 }
 0x4c2   : > { %s3206_s16 = smov %s2654_s17  ;;  %s3207_s17 = smov %s2755_s8 }
 0x4c3   : > { %s3208_s18 = smov %s2738_s26  ;;  %17 = sbr.rel (!%p15_p7) target bundleno = 4 (0x4), region = 83 }
 0x4c8   :  { %1716 = vsyncpa [#allocation3], 1 }
 0x4c9   :  { %1718 = vsyncpa [#allocation3 + $0x1], 1 }
 0x4ca   :  { %1719 = vsyncpa [#allocation5], 1 }

</bundles_post_ra>
